<compile_context>
chip_gen: v6e
topology: v6e:2x2x1
jax: 0.10.0
libtpu: 0.0.40
codegen_flags: <defaults>
</compile_context>

<pallas_src>
import functools

import numpy as np

import jax
import jax.numpy as jnp
from jax.experimental import pallas as pl
from jax.experimental.pallas import tpu as pltpu


def _round_up(n, m):
    return ((n + m - 1) // m) * m


# ----------------------------------------------------------------------------
# Fused kernel: (3x3 conv + bias + ReLU) x 2 for one batch tile, with the
# batch*spatial axis lane-dense.  Taps are extracted with lane rotations +
# per-image border masks; each conv is a single bf16 MXU matmul with K = 9*C.
# ----------------------------------------------------------------------------
def _conv_block_kernel(mask_ref, x_ref, w1_ref, b1_ref, w2_ref, b2_ref, o_ref,
                       *, width):
    # mask_ref: (9, N)  f32 border masks, tap order (kh, kw), tiled per image
    # x_ref   : (Cin_p, N)       activations, channels on sublanes, N = TB*H*W
    # w1_ref  : (C1_p, 9*Cin_p)  bf16 folded conv1+BN1 weights (K tap-major, ch-minor)
    # b1_ref  : (C1_p, 1)        f32 folded bias (sublane column)
    # w2_ref  : (Cout_p, 9*C1_p) bf16 folded conv2+BN2 weights
    # b2_ref  : (Cout_p, 1)      f32
    # o_ref   : (Cout_p, N)
    n = x_ref.shape[-1]
    # Tap (dh, dw) reads x[i+dh, j+dw]  ==  roll the flat lane axis by -(dh*W+dw).
    shifts = [(-(dh * width + dw)) % n for dh in (-1, 0, 1) for dw in (-1, 0, 1)]
    masks = mask_ref[...]                      # (9, N), loaded once, reused by both layers

    def conv3x3_bias_relu(x, w_mat, b_col):
        taps = []
        for t, sh in enumerate(shifts):
            shifted = x if sh == 0 else pltpu.roll(x, sh, axis=1)   # XLU lane rotate
            if t == 4:                                   # center tap: mask is all ones
                tap = shifted
            else:
                tap = shifted * masks[t:t + 1]           # zero the halo wrap (f32 VALU)
            taps.append(tap.astype(jnp.bfloat16))        # bf16 operand for the MXU
        patch = jnp.concatenate(taps, axis=0)            # (9*C, N) bf16 im2col
        acc = jnp.dot(w_mat, patch,                      # one MXU matmul, f32 accumulate
                      preferred_element_type=jnp.float32)
        return jnp.maximum(acc + b_col, 0.0)             # f32 bias + ReLU epilogue

    h = conv3x3_bias_relu(x_ref[...], w1_ref[...], b1_ref[...])
    # Dropout2d(p=0.0) (module default / eval mode) is the identity.
    # TODO(synk): training-mode Dropout2d (p > 0) via pltpu.prng_seed/prng_random_bits.
    y = conv3x3_bias_relu(h, w2_ref[...], b2_ref[...])
    o_ref[...] = y.astype(o_ref.dtype)


def _build_tap_masks(height, width):
    """(9, H*W) f32 masks zeroing positions where a tap falls outside the image."""
    hw = height * width
    row = np.arange(hw) // width
    col = np.arange(hw) % width
    ms = []
    for dh in (-1, 0, 1):
        for dw in (-1, 0, 1):
            valid = ((row + dh >= 0) & (row + dh < height) &
                     (col + dw >= 0) & (col + dw < width))
            ms.append(valid.astype(np.float32))
    return jnp.asarray(np.stack(ms, axis=0))


def _pick_batch_tiles(batch, hw, target_lanes=8192):
    """More than one grid step only when each step still has a large lane extent.

    Multiple tiles let the ("parallel",) batch axis shard across v7x's two
    TensorCores; a single tile minimizes grid-step overhead on v5e/v6e.
    """
    tiles = min(batch, max(1, (batch * hw) // target_lanes))
    while batch % tiles:
        tiles -= 1
    return tiles


def conv_block_forward(x_nchw, params, out_channels, batch_tiles=None):
    """ConvBlock forward.  Input/Output: NCHW (PyTorch convention)."""
    (w1, b1), (w2, b2) = params
    B, cin, H, Wd = x_nchw.shape
    HW = H * Wd
    # TODO(synk): generalize to H*W not a multiple of 128 (pad the flat spatial axis).
    assert HW % 128 == 0, "H*W must be a multiple of 128 for the lane-dense layout"

    cin_p = w1.shape[1] // 9          # channel counts, padded to multiples of 16
    c1_p = w1.shape[0]
    cout_p = w2.shape[0]
    assert w2.shape[1] == 9 * c1_p

    tiles = batch_tiles if batch_tiles is not None else _pick_batch_tiles(B, HW)
    assert B % tiles == 0
    tb = B // tiles
    n = tb * HW                       # lanes per grid step

    # NCHW -> (C_p, B*HW): channels on sublanes, batch*spatial lane-dense.
    x = jnp.transpose(x_nchw.reshape(B, cin, HW), (1, 0, 2)).reshape(cin, B * HW)
    if cin_p != cin:
        x = jnp.pad(x, ((0, cin_p - cin), (0, 0)))       # tiny channel-align pad

    masks = jnp.tile(_build_tap_masks(H, Wd), (1, tb))   # (9, tb*HW), per-image tiling

    y = pl.pallas_call(
        functools.partial(_conv_block_kernel, width=Wd),
        out_shape=jax.ShapeDtypeStruct((cout_p, B * HW), x_nchw.dtype),
        grid=(tiles,),
        in_specs=[
            pl.BlockSpec((9, n), lambda t: (0, 0)),
            pl.BlockSpec((cin_p, n), lambda t: (0, t)),
            pl.BlockSpec((c1_p, 9 * cin_p), lambda t: (0, 0)),
            pl.BlockSpec((c1_p, 1), lambda t: (0, 0)),
            pl.BlockSpec((cout_p, 9 * c1_p), lambda t: (0, 0)),
            pl.BlockSpec((cout_p, 1), lambda t: (0, 0)),
        ],
        out_specs=pl.BlockSpec((cout_p, n), lambda t: (0, t)),
        # TODO(synk): at production channel widths (C >= 128) on v7x, replace the
        # concatenated im2col with per-tap accumulation into a VMEM scratch and
        # set vmem_limit_bytes for the 64 MiB budget.
        compiler_params=pltpu.CompilerParams(dimension_semantics=("parallel",)),
    )(masks, x, w1, b1, w2, b2)

    y = y[:out_channels].reshape(out_channels, B, H, Wd)
    return jnp.transpose(y, (1, 0, 2, 3))


# ----------------------------------------------------------------------------
# Parameter construction + inference-BN folding (glue, plain JAX).
# ----------------------------------------------------------------------------
def _make_conv_bn_params(key, cin, cout):
    kw_, kb_, kg_, kbeta_ = jax.random.split(key, 4)
    w = 0.1 * jax.random.normal(kw_, (cout, cin, 3, 3), jnp.float32)   # OIHW (PyTorch)
    b = 0.1 * jax.random.normal(kb_, (cout,), jnp.float32)
    gamma = 1.0 + 0.05 * jax.random.normal(kg_, (cout,), jnp.float32)
    beta = 0.05 * jax.random.normal(kbeta_, (cout,), jnp.float32)
    mean = jnp.zeros((cout,), jnp.float32)     # BN init running stats (inference mode)
    var = jnp.ones((cout,), jnp.float32)
    eps = 1e-5

    # Fold inference BN into the conv: y = scale*(conv(x)+b - mean) + beta
    scale = gamma / jnp.sqrt(var + eps)
    w_eff = w * scale[:, None, None, None]
    b_eff = scale * (b - mean) + beta

    # Pad channel dims to multiples of 16 (bf16 sublane tile) and reshape to the
    # matmul form with K ordered (kh, kw, cin) -- matches the kernel's tap order.
    cin_p, cout_p = _round_up(cin, 16), _round_up(cout, 16)
    w_eff = jnp.pad(w_eff, ((0, cout_p - cout), (0, cin_p - cin), (0, 0), (0, 0)))
    b_eff = jnp.pad(b_eff, ((0, cout_p - cout),))
    w_mat = (jnp.transpose(w_eff, (0, 2, 3, 1))
             .reshape(cout_p, 9 * cin_p)
             .astype(jnp.bfloat16))            # bf16 MXU operand
    b_col = b_eff.reshape(cout_p, 1)           # f32 bias column (epilogue stays f32)

    raw = dict(w=w, b=b, gamma=gamma, beta=beta, mean=mean, var=var, eps=eps)
    return (w_mat, b_col), raw


# Pure-JAX reference (conv -> BN(inference) -> ReLU -> Dropout(p=0)) x 2.
def _conv_block_reference(x_nchw, raw_params):
    def layer(x, p):
        y = jax.lax.conv_general_dilated(
            x, p["w"], window_strides=(1, 1), padding=((1, 1), (1, 1)),
            dimension_numbers=("NCHW", "OIHW", "NCHW"),
            precision=jax.lax.Precision.HIGHEST)
        y = y + p["b"][None, :, None, None]
        scale = (p["gamma"] / jnp.sqrt(p["var"] + p["eps"]))[None, :, None, None]
        y = scale * (y - p["mean"][None, :, None, None]) + p["beta"][None, :, None, None]
        return jnp.maximum(y, 0.0)
    x = layer(x_nchw, raw_params[0])
    return layer(x, raw_params[1])


if __name__ == "__main__":
    B, C_IN, C_OUT, H, W = 2, 4, 8, 16, 16

    key = jax.random.PRNGKey(0)
    kx, k1, k2 = jax.random.split(key, 3)
    x = jax.random.normal(kx, (B, C_IN, H, W), jnp.float32)

    (p1, raw1) = _make_conv_bn_params(k1, C_IN, C_OUT)
    (p2, raw2) = _make_conv_bn_params(k2, C_OUT, C_OUT)

    fwd = jax.jit(functools.partial(conv_block_forward,
                                    params=(p1, p2), out_channels=C_OUT))
    out = jax.block_until_ready(fwd(x))
    assert out.shape == (B, C_OUT, H, W), out.shape
    assert bool(jnp.all(out >= 0.0))            # ReLU output is non-negative

    ref = _conv_block_reference(x, (raw1, raw2))
    # bf16 MXU operands vs an f32 HIGHEST-precision reference -> slightly looser tol.
    max_err = float(jnp.max(jnp.abs(out - ref)))
    assert max_err < 5e-2, f"mismatch vs pure-JAX reference: {max_err}"
    print("KERNEL_OK")
</pallas_src>

<mosaic_0001>
module attributes {stable_mosaic.version = 11 : i64} {
  func.func @_conv_block_kernel(%arg0: i32, %arg1: memref<9x512xf32, #tpu.memory_space<vmem>>, %arg2: memref<16x512xf32, #tpu.memory_space<vmem>>, %arg3: memref<16x144xbf16, #tpu.memory_space<vmem>>, %arg4: memref<16x1xf32, #tpu.memory_space<vmem>>, %arg5: memref<16x144xbf16, #tpu.memory_space<vmem>>, %arg6: memref<16x1xf32, #tpu.memory_space<vmem>>, %arg7: memref<16x512xf32, #tpu.memory_space<vmem>>) attributes {dimension_semantics = [#tpu.dimension_semantics<parallel>], iteration_bounds = array<i64: 1>, scalar_prefetch = 0 : i64, scratch_operands = 0 : i64, tpu.core_type = #tpu.core_type<tc>, window_params = [{pipeline_mode = #tpu.pipeline_mode<synchronous>, transform_indices = @transform_0, window_bounds = array<i64: 9, 512>}, {transform_indices = @transform_1, window_bounds = array<i64: 16, 512>}, {pipeline_mode = #tpu.pipeline_mode<synchronous>, transform_indices = @transform_2, window_bounds = array<i64: 16, 144>}, {pipeline_mode = #tpu.pipeline_mode<synchronous>, transform_indices = @transform_3, window_bounds = array<i64: 16, 1>}, {pipeline_mode = #tpu.pipeline_mode<synchronous>, transform_indices = @transform_4, window_bounds = array<i64: 16, 144>}, {pipeline_mode = #tpu.pipeline_mode<synchronous>, transform_indices = @transform_5, window_bounds = array<i64: 16, 1>}, {transform_indices = @transform_6, window_bounds = array<i64: 16, 512>}]} {
    %c0 = arith.constant 0 : index
    %c0_0 = arith.constant 0 : index
    %0 = vector.load %arg1[%c0, %c0_0] : memref<9x512xf32, #tpu.memory_space<vmem>>, vector<9x512xf32>
    %c0_1 = arith.constant 0 : index
    %c0_2 = arith.constant 0 : index
    %1 = vector.load %arg2[%c0_1, %c0_2] : memref<16x512xf32, #tpu.memory_space<vmem>>, vector<16x512xf32>
    %c0_3 = arith.constant 0 : index
    %c0_4 = arith.constant 0 : index
    %2 = vector.load %arg3[%c0_3, %c0_4] : memref<16x144xbf16, #tpu.memory_space<vmem>>, vector<16x144xbf16>
    %c0_5 = arith.constant 0 : index
    %c0_6 = arith.constant 0 : index
    %3 = vector.load %arg4[%c0_5, %c0_6] : memref<16x1xf32, #tpu.memory_space<vmem>>, vector<16x1xf32>
    %c17_i32 = arith.constant 17 : i32
    %4 = tpu.dynamic_rotate %1 by %c17_i32 dim 1 : vector<16x512xf32>, i32 -> vector<16x512xf32>
    %5 = vector.extract_strided_slice %0 {offsets = [0, 0], sizes = [1, 512], strides = [1, 1]} : vector<9x512xf32> to vector<1x512xf32>
    %6 = vector.broadcast %5 : vector<1x512xf32> to vector<16x512xf32>
    %7 = arith.mulf %4, %6 : vector<16x512xf32>
    %8 = arith.truncf %7 : vector<16x512xf32> to vector<16x512xbf16>
    %c16_i32 = arith.constant 16 : i32
    %9 = tpu.dynamic_rotate %1 by %c16_i32 dim 1 : vector<16x512xf32>, i32 -> vector<16x512xf32>
    %10 = vector.extract_strided_slice %0 {offsets = [1, 0], sizes = [1, 512], strides = [1, 1]} : vector<9x512xf32> to vector<1x512xf32>
    %11 = vector.broadcast %10 : vector<1x512xf32> to vector<16x512xf32>
    %12 = arith.mulf %9, %11 : vector<16x512xf32>
    %13 = arith.truncf %12 : vector<16x512xf32> to vector<16x512xbf16>
    %c15_i32 = arith.constant 15 : i32
    %14 = tpu.dynamic_rotate %1 by %c15_i32 dim 1 : vector<16x512xf32>, i32 -> vector<16x512xf32>
    %15 = vector.extract_strided_slice %0 {offsets = [2, 0], sizes = [1, 512], strides = [1, 1]} : vector<9x512xf32> to vector<1x512xf32>
    %16 = vector.broadcast %15 : vector<1x512xf32> to vector<16x512xf32>
    %17 = arith.mulf %14, %16 : vector<16x512xf32>
    %18 = arith.truncf %17 : vector<16x512xf32> to vector<16x512xbf16>
    %c1_i32 = arith.constant 1 : i32
    %19 = tpu.dynamic_rotate %1 by %c1_i32 dim 1 : vector<16x512xf32>, i32 -> vector<16x512xf32>
    %20 = vector.extract_strided_slice %0 {offsets = [3, 0], sizes = [1, 512], strides = [1, 1]} : vector<9x512xf32> to vector<1x512xf32>
    %21 = vector.broadcast %20 : vector<1x512xf32> to vector<16x512xf32>
    %22 = arith.mulf %19, %21 : vector<16x512xf32>
    %23 = arith.truncf %22 : vector<16x512xf32> to vector<16x512xbf16>
    %24 = arith.truncf %1 : vector<16x512xf32> to vector<16x512xbf16>
    %c511_i32 = arith.constant 511 : i32
    %25 = tpu.dynamic_rotate %1 by %c511_i32 dim 1 : vector<16x512xf32>, i32 -> vector<16x512xf32>
    %26 = vector.extract_strided_slice %0 {offsets = [5, 0], sizes = [1, 512], strides = [1, 1]} : vector<9x512xf32> to vector<1x512xf32>
    %27 = vector.broadcast %26 : vector<1x512xf32> to vector<16x512xf32>
    %28 = arith.mulf %25, %27 : vector<16x512xf32>
    %29 = arith.truncf %28 : vector<16x512xf32> to vector<16x512xbf16>
    %c497_i32 = arith.constant 497 : i32
    %30 = tpu.dynamic_rotate %1 by %c497_i32 dim 1 : vector<16x512xf32>, i32 -> vector<16x512xf32>
    %31 = vector.extract_strided_slice %0 {offsets = [6, 0], sizes = [1, 512], strides = [1, 1]} : vector<9x512xf32> to vector<1x512xf32>
    %32 = vector.broadcast %31 : vector<1x512xf32> to vector<16x512xf32>
    %33 = arith.mulf %30, %32 : vector<16x512xf32>
    %34 = arith.truncf %33 : vector<16x512xf32> to vector<16x512xbf16>
    %c496_i32 = arith.constant 496 : i32
    %35 = tpu.dynamic_rotate %1 by %c496_i32 dim 1 : vector<16x512xf32>, i32 -> vector<16x512xf32>
    %36 = vector.extract_strided_slice %0 {offsets = [7, 0], sizes = [1, 512], strides = [1, 1]} : vector<9x512xf32> to vector<1x512xf32>
    %37 = vector.broadcast %36 : vector<1x512xf32> to vector<16x512xf32>
    %38 = arith.mulf %35, %37 : vector<16x512xf32>
    %39 = arith.truncf %38 : vector<16x512xf32> to vector<16x512xbf16>
    %c495_i32 = arith.constant 495 : i32
    %40 = tpu.dynamic_rotate %1 by %c495_i32 dim 1 : vector<16x512xf32>, i32 -> vector<16x512xf32>
    %41 = vector.extract_strided_slice %0 {offsets = [8, 0], sizes = [1, 512], strides = [1, 1]} : vector<9x512xf32> to vector<1x512xf32>
    %42 = vector.broadcast %41 : vector<1x512xf32> to vector<16x512xf32>
    %43 = arith.mulf %40, %42 : vector<16x512xf32>
    %44 = arith.truncf %43 : vector<16x512xf32> to vector<16x512xbf16>
    %45 = tpu.concatenate %8, %13, %18, %23, %24, %29, %34, %39, %44 in 0 : vector<16x512xbf16>, vector<16x512xbf16>, vector<16x512xbf16>, vector<16x512xbf16>, vector<16x512xbf16>, vector<16x512xbf16>, vector<16x512xbf16>, vector<16x512xbf16>, vector<16x512xbf16> -> vector<144x512xbf16>
    %cst = arith.constant dense<0.000000e+00> : vector<16x512xf32>
    %46 = tpu.matmul %2, %45, %cst {dimension_numbers = #tpu.dot_dimension_numbers<[1], [0], [0], [1], [0, 0, 1, 1], [], []>} : vector<16x144xbf16>, vector<144x512xbf16>, vector<16x512xf32> -> vector<16x512xf32>
    %47 = vector.broadcast %3 : vector<16x1xf32> to vector<16x512xf32>
    %48 = arith.addf %46, %47 : vector<16x512xf32>
    %cst_7 = arith.constant 0.000000e+00 : f32
    %49 = vector.broadcast %cst_7 : f32 to vector<16x512xf32>
    %50 = arith.maximumf %48, %49 : vector<16x512xf32>
    %c0_8 = arith.constant 0 : index
    %c0_9 = arith.constant 0 : index
    %51 = vector.load %arg5[%c0_8, %c0_9] : memref<16x144xbf16, #tpu.memory_space<vmem>>, vector<16x144xbf16>
    %c0_10 = arith.constant 0 : index
    %c0_11 = arith.constant 0 : index
    %52 = vector.load %arg6[%c0_10, %c0_11] : memref<16x1xf32, #tpu.memory_space<vmem>>, vector<16x1xf32>
    %c17_i32_12 = arith.constant 17 : i32
    %53 = tpu.dynamic_rotate %50 by %c17_i32_12 dim 1 : vector<16x512xf32>, i32 -> vector<16x512xf32>
    %54 = vector.extract_strided_slice %0 {offsets = [0, 0], sizes = [1, 512], strides = [1, 1]} : vector<9x512xf32> to vector<1x512xf32>
    %55 = vector.broadcast %54 : vector<1x512xf32> to vector<16x512xf32>
    %56 = arith.mulf %53, %55 : vector<16x512xf32>
    %57 = arith.truncf %56 : vector<16x512xf32> to vector<16x512xbf16>
    %c16_i32_13 = arith.constant 16 : i32
    %58 = tpu.dynamic_rotate %50 by %c16_i32_13 dim 1 : vector<16x512xf32>, i32 -> vector<16x512xf32>
    %59 = vector.extract_strided_slice %0 {offsets = [1, 0], sizes = [1, 512], strides = [1, 1]} : vector<9x512xf32> to vector<1x512xf32>
    %60 = vector.broadcast %59 : vector<1x512xf32> to vector<16x512xf32>
    %61 = arith.mulf %58, %60 : vector<16x512xf32>
    %62 = arith.truncf %61 : vector<16x512xf32> to vector<16x512xbf16>
    %c15_i32_14 = arith.constant 15 : i32
    %63 = tpu.dynamic_rotate %50 by %c15_i32_14 dim 1 : vector<16x512xf32>, i32 -> vector<16x512xf32>
    %64 = vector.extract_strided_slice %0 {offsets = [2, 0], sizes = [1, 512], strides = [1, 1]} : vector<9x512xf32> to vector<1x512xf32>
    %65 = vector.broadcast %64 : vector<1x512xf32> to vector<16x512xf32>
    %66 = arith.mulf %63, %65 : vector<16x512xf32>
    %67 = arith.truncf %66 : vector<16x512xf32> to vector<16x512xbf16>
    %c1_i32_15 = arith.constant 1 : i32
    %68 = tpu.dynamic_rotate %50 by %c1_i32_15 dim 1 : vector<16x512xf32>, i32 -> vector<16x512xf32>
    %69 = vector.extract_strided_slice %0 {offsets = [3, 0], sizes = [1, 512], strides = [1, 1]} : vector<9x512xf32> to vector<1x512xf32>
    %70 = vector.broadcast %69 : vector<1x512xf32> to vector<16x512xf32>
    %71 = arith.mulf %68, %70 : vector<16x512xf32>
    %72 = arith.truncf %71 : vector<16x512xf32> to vector<16x512xbf16>
    %73 = arith.truncf %50 : vector<16x512xf32> to vector<16x512xbf16>
    %c511_i32_16 = arith.constant 511 : i32
    %74 = tpu.dynamic_rotate %50 by %c511_i32_16 dim 1 : vector<16x512xf32>, i32 -> vector<16x512xf32>
    %75 = vector.extract_strided_slice %0 {offsets = [5, 0], sizes = [1, 512], strides = [1, 1]} : vector<9x512xf32> to vector<1x512xf32>
    %76 = vector.broadcast %75 : vector<1x512xf32> to vector<16x512xf32>
    %77 = arith.mulf %74, %76 : vector<16x512xf32>
    %78 = arith.truncf %77 : vector<16x512xf32> to vector<16x512xbf16>
    %c497_i32_17 = arith.constant 497 : i32
    %79 = tpu.dynamic_rotate %50 by %c497_i32_17 dim 1 : vector<16x512xf32>, i32 -> vector<16x512xf32>
    %80 = vector.extract_strided_slice %0 {offsets = [6, 0], sizes = [1, 512], strides = [1, 1]} : vector<9x512xf32> to vector<1x512xf32>
    %81 = vector.broadcast %80 : vector<1x512xf32> to vector<16x512xf32>
    %82 = arith.mulf %79, %81 : vector<16x512xf32>
    %83 = arith.truncf %82 : vector<16x512xf32> to vector<16x512xbf16>
    %c496_i32_18 = arith.constant 496 : i32
    %84 = tpu.dynamic_rotate %50 by %c496_i32_18 dim 1 : vector<16x512xf32>, i32 -> vector<16x512xf32>
    %85 = vector.extract_strided_slice %0 {offsets = [7, 0], sizes = [1, 512], strides = [1, 1]} : vector<9x512xf32> to vector<1x512xf32>
    %86 = vector.broadcast %85 : vector<1x512xf32> to vector<16x512xf32>
    %87 = arith.mulf %84, %86 : vector<16x512xf32>
    %88 = arith.truncf %87 : vector<16x512xf32> to vector<16x512xbf16>
    %c495_i32_19 = arith.constant 495 : i32
    %89 = tpu.dynamic_rotate %50 by %c495_i32_19 dim 1 : vector<16x512xf32>, i32 -> vector<16x512xf32>
    %90 = vector.extract_strided_slice %0 {offsets = [8, 0], sizes = [1, 512], strides = [1, 1]} : vector<9x512xf32> to vector<1x512xf32>
    %91 = vector.broadcast %90 : vector<1x512xf32> to vector<16x512xf32>
    %92 = arith.mulf %89, %91 : vector<16x512xf32>
    %93 = arith.truncf %92 : vector<16x512xf32> to vector<16x512xbf16>
    %94 = tpu.concatenate %57, %62, %67, %72, %73, %78, %83, %88, %93 in 0 : vector<16x512xbf16>, vector<16x512xbf16>, vector<16x512xbf16>, vector<16x512xbf16>, vector<16x512xbf16>, vector<16x512xbf16>, vector<16x512xbf16>, vector<16x512xbf16>, vector<16x512xbf16> -> vector<144x512xbf16>
    %cst_20 = arith.constant dense<0.000000e+00> : vector<16x512xf32>
    %95 = tpu.matmul %51, %94, %cst_20 {dimension_numbers = #tpu.dot_dimension_numbers<[1], [0], [0], [1], [0, 0, 1, 1], [], []>} : vector<16x144xbf16>, vector<144x512xbf16>, vector<16x512xf32> -> vector<16x512xf32>
    %96 = vector.broadcast %52 : vector<16x1xf32> to vector<16x512xf32>
    %97 = arith.addf %95, %96 : vector<16x512xf32>
    %cst_21 = arith.constant 0.000000e+00 : f32
    %98 = vector.broadcast %cst_21 : f32 to vector<16x512xf32>
    %99 = arith.maximumf %97, %98 : vector<16x512xf32>
    %c0_22 = arith.constant 0 : index
    %c0_23 = arith.constant 0 : index
    %100 = vector.load %arg7[%c0_22, %c0_23] : memref<16x512xf32, #tpu.memory_space<vmem>>, vector<16x512xf32>
    tpu.vector_store %arg7[%c0_22, %c0_23], %99 {strides = array<i32>} : memref<16x512xf32, #tpu.memory_space<vmem>>, vector<16x512xf32>,
    return
  }
  func.func @transform_0(%arg0: i32) -> (i32, i32) {
    %c0_i32 = arith.constant 0 : i32
    %c0_i32_0 = arith.constant 0 : i32
    %c0_i32_1 = arith.constant 0 : i32
    return %c0_i32, %c0_i32_0 : i32, i32
  }
  func.func @transform_1(%arg0: i32) -> (i32, i32) {
    %c0_i32 = arith.constant 0 : i32
    %c0_i32_0 = arith.constant 0 : i32
    return %c0_i32, %arg0 : i32, i32
  }
  func.func @transform_2(%arg0: i32) -> (i32, i32) {
    %c0_i32 = arith.constant 0 : i32
    %c0_i32_0 = arith.constant 0 : i32
    %c0_i32_1 = arith.constant 0 : i32
    return %c0_i32, %c0_i32_0 : i32, i32
  }
  func.func @transform_3(%arg0: i32) -> (i32, i32) {
    %c0_i32 = arith.constant 0 : i32
    %c0_i32_0 = arith.constant 0 : i32
    %c0_i32_1 = arith.constant 0 : i32
    return %c0_i32, %c0_i32_0 : i32, i32
  }
  func.func @transform_4(%arg0: i32) -> (i32, i32) {
    %c0_i32 = arith.constant 0 : i32
    %c0_i32_0 = arith.constant 0 : i32
    %c0_i32_1 = arith.constant 0 : i32
    return %c0_i32, %c0_i32_0 : i32, i32
  }
  func.func @transform_5(%arg0: i32) -> (i32, i32) {
    %c0_i32 = arith.constant 0 : i32
    %c0_i32_0 = arith.constant 0 : i32
    %c0_i32_1 = arith.constant 0 : i32
    return %c0_i32, %c0_i32_0 : i32, i32
  }
  func.func @transform_6(%arg0: i32) -> (i32, i32) {
    %c0_i32 = arith.constant 0 : i32
    %c0_i32_0 = arith.constant 0 : i32
    return %c0_i32, %arg0 : i32, i32
  }
}

</mosaic_0001>

<bundles_post_ra>
// kernel: conv_block_forward.1
= control target key start
LH: loop header
LB: loop body
LE: loop exit
PB: predicated region body
PF: predicated region fallthrough
CT: control target
= control target key end

     0   :  { %s1044_s25 = smov 112   ;;  %s1045_s14 = smov 113   ;;  %v60_v8 = vlaneseq  ;;  %vm493_vm0 = vcmask 130048   ;;  %v1052_v25 = vmov 0   ;;  %s2117_s1 = inlined_call_operand.vmem [shape: f32[16,512], index: 1, kind: input, shape index: {}]   ;;  %s2118_s2 = inlined_call_operand.vmem [shape: bf16[16,144], index: 2, kind: input, shape index: {}]   ;;  %s2119_s0 = inlined_call_operand.vmem [shape: f32[9,512], index: 0, kind: input, shape index: {}]   ;;  %s2120_s3 = inlined_call_operand.vmem [shape: f32[16,1], index: 3, kind: input, shape index: {}]   ;;  %s2121_s4 = inlined_call_operand.vmem [shape: bf16[16,144], index: 4, kind: input, shape index: {}]   ;;  %s2122_s5 = inlined_call_operand.vmem [shape: f32[16,1], index: 5, kind: input, shape index: {}]   ;;  %s2123_s6 = inlined_call_operand.vmem [shape: f32[16,512], index: 6, kind: output, shape index: {}]  }
   0x1   :  { %v1091_v0 = vld [vmem:[%s2117_s1 + $0x8] sm:$0xff]  ;;  %v1096_v1 = vld [vmem:[%s2117_s1] sm:$0xff]  ;;  %v1119_v4 = vld [vmem:[%s2117_s1 + $0x30] sm:$0xff]  ;;  %s1047_s15 = smov 1   ;;  %s1048_s16 = smov 15   ;;  %1036 = vset.pattern.permute.xlu0 %v1052_v25  ;;  %1037 = vset.pattern.permute.xlu1 %v1052_v25 }
   0x2   :  { %372 = vrot.lane.b32.xlu1 %v1091_v0, %s1044_s25  ;;  %368 = vrot.lane.b32.xlu0 %v1096_v1, %s1044_s25  ;;  %v1105_v2 = vld [vmem:[%s2117_s1 + $0x28] sm:$0xff]  ;;  %v1110_v3 = vld [vmem:[%s2117_s1 + $0x20] sm:$0xff]  ;;  %s1049_s17 = smov 16   ;;  %s1050_s18 = smov 17   ;;  %v1244_v9 = vshrl.u32 %v60_v8, 7  ;;  %v1246_v11 = vand.u32 127, %v60_v8 }
   0x3   :  { %v1124_v5 = vld [vmem:[%s2117_s1 + $0x10] sm:$0xff]  ;;  %v1133_v6 = vld [vmem:[%s2117_s1 + $0x38] sm:$0xff]  ;;  %s1051_s19 = smov 111   ;;  %v1040_v13 = vld [vmem:[%s2118_s2 + $0x4] ss:$8 sps:$4 sm:$0xff]  }
   0x4   :  { %v1138_v7 = vld [vmem:[%s2117_s1 + $0x18] sm:$0xff]  ;;  %s1046_s1 = smov 127   ;;  %v395_v14 = vsub.s32 7, %v1244_v9  ;;  %v1259_v15 = vld [vmem:[%s2119_s0 + $0x8] sm:$0xff]  ;;  %v1264_v16 = vld [vmem:[%s2119_s0] sm:$0xff]  ;;  %1021 = vmatprep.mubr.msk.bf16.mxu0 %vm493_vm0, %v1040_v13  ;;  %1022 = vmatprep.mubr.msk.bf16.mxu1 %vm493_vm0, %v1040_v13  ;;  %vm384_vm1 = vcmp.lt.s32.totalorder %v1246_v11, 112 }
   0x5   :  { %v1284_v22 = vld [vmem:[%s2119_s0 + $0x18] sm:$0xff]  ;;  %v1289_v23 = vld [vmem:[%s2119_s0 + $0x10] sm:$0xff]  ;;  %v42_v40 = vld [vmem:[%s2120_s3] sm:$0xff]  ;;  %v342_v54 = vsub.s32 6, %v1244_v9  ;;  %vm331_vm2 = vcmp.lt.s32.totalorder %v1246_v11, 113  ;;  %vm278_vm3 = vcmp.lt.s32.totalorder %v1246_v11, 127 }
   0x6   :  { %374 = vrot.lane.b32.xlu1 %v1105_v2, %s1044_s25  ;;  %370 = vrot.lane.b32.xlu0 %v1110_v3, %s1044_s25  ;;  %v1276_v20 = vrot.slane %v1259_v15, %v395_v14  ;;  %v1279_v21 = vrot.slane %v1264_v16, %v395_v14  ;;  %v1299_v31 = vrot.slane %v1284_v22, %v395_v14  ;;  %v43_v45 = vld [vmem:[%s2120_s3 + $0x8] sm:$0xff]  ;;  %vm221_vm4 = vcmp.lt.s32.totalorder %v1246_v11, 1 }
   0x7   :  { %v1302_v32 = vrot.slane %v1289_v23, %v395_v14  ;;  %v1332_v56 = vrot.slane %v1264_v16, %v342_v54  ;;  %v1339_v60 = vrot.slane %v1259_v15, %v342_v54  ;;  %vm168_vm5 = vcmp.lt.s32.totalorder %v1246_v11, 15 }
   0x8   :  { %vm115_vm6 = vcmp.lt.s32.totalorder %v1246_v11, 16  ;;  %vm62_vm7 = vcmp.lt.s32.totalorder %v1246_v11, 17  ;;  %vm437_vm8 = vcmp.lt.s32.totalorder %v1246_v11, 111 }
   0xa   :  { %378 = vrot.lane.b32.xlu1 %v1119_v4, %s1044_s25  ;;  %376 = vrot.lane.b32.xlu0 %v1124_v5, %s1044_s25 }
   0xe   :  { %382 = vrot.lane.b32.xlu1 %v1133_v6, %s1044_s25  ;;  %380 = vrot.lane.b32.xlu0 %v1138_v7, %s1044_s25 }
  0x12   :  { %317 = vrot.lane.b32.xlu1 %v1110_v3, %s1045_s14  ;;  %315 = vrot.lane.b32.xlu0 %v1096_v1, %s1045_s14 }
  0x16   :  { %321 = vrot.lane.b32.xlu1 %v1105_v2, %s1045_s14  ;;  %319 = vrot.lane.b32.xlu0 %v1091_v0, %s1045_s14 }
  0x1a   :  { %325 = vrot.lane.b32.xlu1 %v1119_v4, %s1045_s14  ;;  %323 = vrot.lane.b32.xlu0 %v1124_v5, %s1045_s14 }
  0x1e   :  { %329 = vrot.lane.b32.xlu1 %v1133_v6, %s1045_s14  ;;  %327 = vrot.lane.b32.xlu0 %v1138_v7, %s1045_s14 }
  0x22   :  { %264 = vrot.lane.b32.xlu1 %v1110_v3, %s1046_s1  ;;  %262 = vrot.lane.b32.xlu0 %v1096_v1, %s1046_s1 }
  0x26   :  { %268 = vrot.lane.b32.xlu1 %v1105_v2, %s1046_s1  ;;  %266 = vrot.lane.b32.xlu0 %v1091_v0, %s1046_s1 }
  0x2a   :  { %272 = vrot.lane.b32.xlu1 %v1119_v4, %s1046_s1  ;;  %270 = vrot.lane.b32.xlu0 %v1124_v5, %s1046_s1 }
  0x2e   :  { %276 = vrot.lane.b32.xlu1 %v1133_v6, %s1046_s1  ;;  %274 = vrot.lane.b32.xlu0 %v1138_v7, %s1046_s1 }
  0x32   :  { %207 = vrot.lane.b32.xlu1 %v1110_v3, %s1047_s15  ;;  %205 = vrot.lane.b32.xlu0 %v1096_v1, %s1047_s15 }
  0x36   :  { %211 = vrot.lane.b32.xlu1 %v1105_v2, %s1047_s15  ;;  %209 = vrot.lane.b32.xlu0 %v1091_v0, %s1047_s15 }
  0x3a   :  { %215 = vrot.lane.b32.xlu1 %v1119_v4, %s1047_s15  ;;  %213 = vrot.lane.b32.xlu0 %v1124_v5, %s1047_s15 }
  0x3e   :  { %219 = vrot.lane.b32.xlu1 %v1133_v6, %s1047_s15  ;;  %217 = vrot.lane.b32.xlu0 %v1138_v7, %s1047_s15 }
  0x42   :  { %154 = vrot.lane.b32.xlu1 %v1110_v3, %s1048_s16  ;;  %152 = vrot.lane.b32.xlu0 %v1096_v1, %s1048_s16 }
  0x46   :  { %158 = vrot.lane.b32.xlu1 %v1105_v2, %s1048_s16  ;;  %156 = vrot.lane.b32.xlu0 %v1091_v0, %s1048_s16 }
  0x4a   :  { %162 = vrot.lane.b32.xlu1 %v1119_v4, %s1048_s16  ;;  %160 = vrot.lane.b32.xlu0 %v1124_v5, %s1048_s16 }
  0x4e   :  { %166 = vrot.lane.b32.xlu1 %v1133_v6, %s1048_s16  ;;  %164 = vrot.lane.b32.xlu0 %v1138_v7, %s1048_s16 }
  0x52   :  { %101 = vrot.lane.b32.xlu1 %v1110_v3, %s1049_s17  ;;  %99 = vrot.lane.b32.xlu0 %v1096_v1, %s1049_s17 }
  0x56   :  { %105 = vrot.lane.b32.xlu1 %v1105_v2, %s1049_s17  ;;  %103 = vrot.lane.b32.xlu0 %v1091_v0, %s1049_s17 }
  0x5a   :  { %109 = vrot.lane.b32.xlu1 %v1119_v4, %s1049_s17  ;;  %107 = vrot.lane.b32.xlu0 %v1124_v5, %s1049_s17 }
  0x5e   :  { %113 = vrot.lane.b32.xlu1 %v1133_v6, %s1049_s17  ;;  %111 = vrot.lane.b32.xlu0 %v1138_v7, %s1049_s17 }
  0x62   :  { %46 = vrot.lane.b32.xlu1 %v1110_v3, %s1050_s18  ;;  %44 = vrot.lane.b32.xlu0 %v1096_v1, %s1050_s18 }
  0x66   :  { %50 = vrot.lane.b32.xlu1 %v1105_v2, %s1050_s18  ;;  %48 = vrot.lane.b32.xlu0 %v1091_v0, %s1050_s18 }
  0x6a   :  { %54 = vrot.lane.b32.xlu1 %v1119_v4, %s1050_s18  ;;  %52 = vrot.lane.b32.xlu0 %v1124_v5, %s1050_s18 }
  0x6e   :  { %58 = vrot.lane.b32.xlu1 %v1133_v6, %s1050_s18  ;;  %56 = vrot.lane.b32.xlu0 %v1138_v7, %s1050_s18 }
  0x72   :  { %423 = vrot.lane.b32.xlu1 %v1110_v3, %s1051_s19  ;;  %421 = vrot.lane.b32.xlu0 %v1096_v1, %s1051_s19 }
  0x74   :  { %v373_v10 = vpop.permute.xlu1 %372  ;;  %v369_v12 = vpop.permute.xlu0 %368 }
  0x75   :  { %v389_v24 = vsel %vm384_vm1, %v369_v12, %v373_v10 }
  0x76   :  { %427 = vrot.lane.b32.xlu1 %v1105_v2, %s1051_s19  ;;  %425 = vrot.lane.b32.xlu0 %v1091_v0, %s1051_s19  ;;  %v409_v35 = vmul.f32 %v1279_v21, %v389_v24 }
  0x78   :  { %v375_v17 = vpop.permute.xlu1 %374  ;;  %v371_v18 = vpop.permute.xlu0 %370 }
  0x79   :  { %v390_v19 = vsel %vm384_vm1, %v371_v18, %v375_v17 }
  0x7a   :  { %431 = vrot.lane.b32.xlu1 %v1119_v4, %s1051_s19  ;;  %429 = vrot.lane.b32.xlu0 %v1124_v5, %s1051_s19  ;;  %v413_v28 = vmul.f32 %v1279_v21, %v390_v19 }
  0x7c   :  { %v379_v26 = vpop.permute.xlu1 %378  ;;  %v377_v27 = vpop.permute.xlu0 %376  ;;  %v417_v39 = vpack.c.bf16 %v413_v28, %v409_v35 }
  0x7d   :  { %v387_v29 = vsel %vm384_vm1, %v373_v10, %v377_v27  ;;  %v388_v30 = vsel %vm384_vm1, %v375_v17, %v379_v26  ;;  %v1350_v17 = vrot.slane %v1289_v23, %v342_v54 }
  0x7e   :  { %435 = vrot.lane.b32.xlu1 %v1133_v6, %s1051_s19  ;;  %433 = vrot.lane.b32.xlu0 %v1138_v7, %s1051_s19  ;;  %v410_v33 = vmul.f32 %v1276_v20, %v387_v29  ;;  %v414_v34 = vmul.f32 %v1276_v20, %v388_v30 }
  0x80   :  { %v383_v36 = vpop.permute.xlu1 %382  ;;  %v381_v37 = vpop.permute.xlu0 %380  ;;  %v418_v38 = vpack.c.bf16 %v414_v34, %v410_v33 }
  0x81   :  { %v386_v41 = vsel %vm384_vm1, %v379_v26, %v383_v36  ;;  %v385_v42 = vsel %vm384_vm1, %v377_v27, %v381_v37  ;;  %v391_v43 = vsel %vm384_vm1, %v381_v37, %v369_v12  ;;  %v392_v44 = vsel %vm384_vm1, %v383_v36, %v371_v18 }
  0x82   :  { %497 = vmatprep.subr.bf16.mxu0 %v418_v38  ;;  %v412_v46 = vmul.f32 %v1299_v31, %v391_v43  ;;  %v416_v47 = vmul.f32 %v1299_v31, %v392_v44  ;;  %v411_v48 = vmul.f32 %v1302_v32, %v385_v42  ;;  %v415_v49 = vmul.f32 %v1302_v32, %v386_v41 }
  0x83   :  { %498 = vmatpush1.bf16.msra.mxu0 %v417_v39  ;;  %476 = vperm.xlu0 %1036, %v42_v40   ;;  %v1353_v18 = vrot.slane %v1284_v22, %v342_v54  ;;  %v289_v41 = vsub.s32 5, %v1244_v9 }
  0x84   :  { %v318_v50 = vpop.permute.xlu1 %317  ;;  %v316_v51 = vpop.permute.xlu0 %315  ;;  %v420_v52 = vpack.c.bf16 %v416_v47, %v412_v46  ;;  %v419_v53 = vpack.c.bf16 %v415_v49, %v411_v48  ;;  %481 = vperm.xlu1 %1037, %v43_v45  }
  0x85   :  { %v1370_v43 = vrot.slane %v1264_v16, %v289_v41  ;;  %v1377_v47 = vrot.slane %v1259_v15, %v289_v41 }
  0x86   :  { %540 = vmatprep.subr.bf16.mxu1 %v420_v52 }
  0x87   :  { %541 = vmatpush1.bf16.msra.mxu1 %v419_v53 }
  0x88   :  { %v322_v55 = vpop.permute.xlu1 %321  ;;  %v320_v57 = vpop.permute.xlu0 %319 }
  0x89   :  { %v337_v58 = vsel %vm331_vm2, %v318_v50, %v322_v55  ;;  %v336_v59 = vsel %vm331_vm2, %v316_v51, %v320_v57 }
  0x8a   :  { %v360_v61 = vmul.f32 %v1332_v56, %v337_v58  ;;  %v356_v62 = vmul.f32 %v1332_v56, %v336_v59  ;;  %v1391_v58 = vrot.slane %v1284_v22, %v289_v41 }
  0x8c   :  { %v326_v63 = vpop.permute.xlu1 %325  ;;  %v324_v8 = vpop.permute.xlu0 %323  ;;  %v364_v26 = vpack.c.bf16 %v360_v61, %v356_v62 }
  0x8d   :  { %v335_v10 = vsel %vm331_vm2, %v322_v55, %v326_v63  ;;  %v334_v12 = vsel %vm331_vm2, %v320_v57, %v324_v8  ;;  %v1388_v57 = vrot.slane %v1289_v23, %v289_v41 }
  0x8e   :  { %v361_v13 = vmul.f32 %v1339_v60, %v335_v10  ;;  %v357_v14 = vmul.f32 %v1339_v60, %v334_v12  ;;  %v259_v10 = vpack.c.bf16 %v1105_v2, %v1091_v0  ;;  %v258_v2 = vpack.c.bf16 %v1110_v3, %v1096_v1 }
  0x90   :  { %v330_v19 = vpop.permute.xlu1 %329  ;;  %v328_v24 = vpop.permute.xlu0 %327  ;;  %v365_v25 = vpack.c.bf16 %v361_v13, %v357_v14 }
  0x91   :  { %v333_v27 = vsel %vm331_vm2, %v326_v63, %v330_v19  ;;  %v339_v28 = vsel %vm331_vm2, %v330_v19, %v318_v50  ;;  %v332_v29 = vsel %vm331_vm2, %v324_v8, %v328_v24  ;;  %v338_v30 = vsel %vm331_vm2, %v328_v24, %v316_v51 }
  0x92   :  { %v362_v33 = vmul.f32 %v1350_v17, %v333_v27  ;;  %v363_v34 = vmul.f32 %v1353_v18, %v339_v28  ;;  %v358_v35 = vmul.f32 %v1350_v17, %v332_v29  ;;  %v359_v36 = vmul.f32 %v1353_v18, %v338_v30  ;;  %499 = vmatprep.subr.bf16.mxu0 %v365_v25 }
  0x93   :  { %500 = vmatpush1.bf16.msra.mxu0 %v364_v26  ;;  %v232_v8 = vsub.s32 3, %v1244_v9 }
  0x94   :  { %v265_v37 = vpop.permute.xlu1 %264  ;;  %v263_v38 = vpop.permute.xlu0 %262  ;;  %v367_v39 = vpack.c.bf16 %v363_v34, %v359_v36  ;;  %v366_v40 = vpack.c.bf16 %v362_v33, %v358_v35  ;;  %v261_v33 = vpack.c.bf16 %v1133_v6, %v1138_v7  ;;  %v260_v35 = vpack.c.bf16 %v1119_v4, %v1124_v5 }
  0x95   :  { %v1414_v34 = vrot.slane %v1259_v15, %v232_v8 }
  0x96   :  { %542 = vmatprep.subr.bf16.mxu1 %v367_v39  ;;  %v1425_v39 = vrot.slane %v1289_v23, %v232_v8 }
  0x97   :  { %543 = vmatpush1.bf16.msra.mxu1 %v366_v40 }
  0x98   :  { %v269_v42 = vpop.permute.xlu1 %268  ;;  %v267_v44 = vpop.permute.xlu0 %266 }
  0x99   :  { %v284_v45 = vsel %vm278_vm3, %v265_v37, %v269_v42  ;;  %v283_v46 = vsel %vm278_vm3, %v263_v38, %v267_v44 }
  0x9a   :  { %v307_v48 = vmul.f32 %v1370_v43, %v284_v45  ;;  %v303_v49 = vmul.f32 %v1370_v43, %v283_v46 }
  0x9c   :  { %v273_v50 = vpop.permute.xlu1 %272  ;;  %v271_v51 = vpop.permute.xlu0 %270  ;;  %v311_v63 = vpack.c.bf16 %v307_v48, %v303_v49 }
  0x9d   :  { %v282_v52 = vsel %vm278_vm3, %v269_v42, %v273_v50  ;;  %v281_v53 = vsel %vm278_vm3, %v267_v44, %v271_v51  ;;  %v1432_v42 = vrot.slane %v1264_v16, %v232_v8  ;;  %v1435_v44 = vrot.slane %v1284_v22, %v232_v8 }
  0x9e   :  { %v308_v54 = vmul.f32 %v1377_v47, %v282_v52  ;;  %v304_v55 = vmul.f32 %v1377_v47, %v281_v53 }
  0xa0   :  { %v277_v59 = vpop.permute.xlu1 %276  ;;  %v275_v61 = vpop.permute.xlu0 %274  ;;  %v312_v62 = vpack.c.bf16 %v308_v54, %v304_v55 }
  0xa1   :  { %v280_v12 = vsel %vm278_vm3, %v273_v50, %v277_v59  ;;  %v286_v13 = vsel %vm278_vm3, %v277_v59, %v265_v37  ;;  %v279_v14 = vsel %vm278_vm3, %v271_v51, %v275_v61  ;;  %v285_v19 = vsel %vm278_vm3, %v275_v61, %v263_v38 }
  0xa2   :  { %v309_v24 = vmul.f32 %v1388_v57, %v280_v12  ;;  %v310_v25 = vmul.f32 %v1391_v58, %v286_v13  ;;  %v305_v26 = vmul.f32 %v1388_v57, %v279_v14  ;;  %v306_v0 = vmul.f32 %v1391_v58, %v285_v19  ;;  %501 = vmatprep.subr.bf16.mxu0 %v312_v62 }
  0xa3   :  { %502 = vmatpush1.bf16.msra.mxu0 %v311_v63  ;;  %v179_v50 = vsub.s32 2, %v1244_v9 }
  0xa4   :  { %v208_v27 = vpop.permute.xlu1 %207  ;;  %v206_v28 = vpop.permute.xlu0 %205  ;;  %v314_v29 = vpack.c.bf16 %v310_v25, %v306_v0  ;;  %v313_v30 = vpack.c.bf16 %v309_v24, %v305_v26  ;;  %503 = vmatprep.subr.bf16.mxu0 %v259_v10 }
  0xa5   :  { %v1454_v14 = vrot.slane %v1259_v15, %v179_v50 }
  0xa6   :  { %544 = vmatprep.subr.bf16.mxu1 %v314_v29 }
  0xa7   :  { %545 = vmatpush1.bf16.msra.mxu1 %v313_v30  ;;  %504 = vmatpush1.bf16.msra.mxu0 %v258_v2 }
  0xa8   :  { %v212_v1 = vpop.permute.xlu1 %211  ;;  %v210_v3 = vpop.permute.xlu0 %209  ;;  %546 = vmatprep.subr.bf16.mxu1 %v261_v33 }
  0xa9   :  { %v227_v36 = vsel %vm221_vm4, %v208_v27, %v212_v1  ;;  %v226_v6 = vsel %vm221_vm4, %v206_v28, %v210_v3 }
  0xaa   :  { %v251_v7 = vmul.f32 %v1414_v34, %v227_v36  ;;  %v247_v37 = vmul.f32 %v1414_v34, %v226_v6 }
  0xab   :  { %547 = vmatpush1.bf16.msra.mxu1 %v260_v35 }
  0xac   :  { %v216_v38 = vpop.permute.xlu1 %215  ;;  %v214_v40 = vpop.permute.xlu0 %213  ;;  %v255_v4 = vpack.c.bf16 %v251_v7, %v247_v37 }
  0xad   :  { %v225_v5 = vsel %vm221_vm4, %v212_v1, %v216_v38  ;;  %v224_v41 = vsel %vm221_vm4, %v210_v3, %v214_v40  ;;  %v1470_v1 = vrot.slane %v1264_v16, %v179_v50  ;;  %v1473_v3 = vrot.slane %v1284_v22, %v179_v50 }
  0xae   :  { %505 = vmatprep.subr.bf16.mxu0 %v255_v4  ;;  %v252_v45 = vmul.f32 %v1425_v39, %v225_v5  ;;  %v248_v46 = vmul.f32 %v1425_v39, %v224_v41 }
  0xaf   :  { %2162 = vst [vmem:[#allocation2_spill] sm:$0xff] %v1473_v3 }
  0xb0   :  { %v220_v48 = vpop.permute.xlu1 %219  ;;  %v218_v49 = vpop.permute.xlu0 %217  ;;  %v256_v13 = vpack.c.bf16 %v252_v45, %v248_v46 }
  0xb1   :  { %v223_v51 = vsel %vm221_vm4, %v216_v38, %v220_v48  ;;  %v229_v52 = vsel %vm221_vm4, %v220_v48, %v208_v27  ;;  %v222_v53 = vsel %vm221_vm4, %v214_v40, %v218_v49  ;;  %v228_v54 = vsel %vm221_vm4, %v218_v49, %v206_v28 }
  0xb2   :  { %v250_v55 = vmul.f32 %v1432_v42, %v229_v52  ;;  %v253_v59 = vmul.f32 %v1435_v44, %v223_v51  ;;  %v246_v61 = vmul.f32 %v1432_v42, %v228_v54  ;;  %v249_v62 = vmul.f32 %v1435_v44, %v222_v53 }
  0xb3   :  { %v1463_v28 = vrot.slane %v1289_v23, %v179_v50  ;;  %v126_v38 = vsub.s32 1, %v1244_v9 }
  0xb4   :  { %v155_v63 = vpop.permute.xlu1 %154  ;;  %v153_v8 = vpop.permute.xlu0 %152  ;;  %v254_v10 = vpack.c.bf16 %v250_v55, %v246_v61  ;;  %v257_v12 = vpack.c.bf16 %v253_v59, %v249_v62 }
  0xb5   :  { %v1492_v55 = vrot.slane %v1259_v15, %v126_v38 }
  0xb6   :  { %506 = vmatpush1.bf16.msra.mxu0 %v254_v10  ;;  %548 = vmatprep.subr.bf16.mxu1 %v257_v12 }
  0xb7   :  { %549 = vmatpush1.bf16.msra.mxu1 %v256_v13  ;;  %2163 = vst [vmem:[#allocation3_spill] sm:$0xff] %v1492_v55  ;;  %v1501_v13 = vrot.slane %v1289_v23, %v126_v38 }
  0xb8   :  { %v159_v19 = vpop.permute.xlu1 %158  ;;  %v157_v24 = vpop.permute.xlu0 %156 }
  0xb9   :  { %v174_v25 = vsel %vm168_vm5, %v155_v63, %v159_v19  ;;  %v173_v26 = vsel %vm168_vm5, %v153_v8, %v157_v24  ;;  %2164 = vst [vmem:[#allocation4_spill] sm:$0xff] %v1501_v13 }
  0xba   :  { %v198_v0 = vmul.f32 %v1454_v14, %v174_v25  ;;  %v194_v2 = vmul.f32 %v1454_v14, %v173_v26 }
  0xbc   :  { %v163_v27 = vpop.permute.xlu1 %162  ;;  %v161_v29 = vpop.permute.xlu0 %160  ;;  %v202_v30 = vpack.c.bf16 %v198_v0, %v194_v2  ;;  %v1508_v0 = vrot.slane %v1264_v16, %v126_v38  ;;  %v1511_v2 = vrot.slane %v1284_v22, %v126_v38 }
  0xbd   :  { %v172_v33 = vsel %vm168_vm5, %v159_v19, %v163_v27  ;;  %v171_v35 = vsel %vm168_vm5, %v157_v24, %v161_v29 }
  0xbe   :  { %507 = vmatprep.subr.bf16.mxu0 %v202_v30  ;;  %v199_v36 = vmul.f32 %v1463_v28, %v172_v33  ;;  %v195_v6 = vmul.f32 %v1463_v28, %v171_v35  ;;  %2165 = vst [vmem:[#allocation5_spill] sm:$0xff] %v1508_v0  ;;  %2166 = vst [vmem:[#allocation6_spill] sm:$0xff] %v1511_v2  ;;  %v73_v35 = vsub.s32 0, %v1244_v9 }
  0xc0   :  { %v167_v7 = vpop.permute.xlu1 %166  ;;  %v165_v37 = vpop.permute.xlu0 %164  ;;  %v203_v54 = vpack.c.bf16 %v199_v36, %v195_v6 }
  0xc1   :  { %v170_v40 = vsel %vm168_vm5, %v163_v27, %v167_v7  ;;  %v176_v4 = vsel %vm168_vm5, %v167_v7, %v155_v63  ;;  %v169_v5 = vsel %vm168_vm5, %v161_v29, %v165_v37  ;;  %v175_v41 = vsel %vm168_vm5, %v165_v37, %v153_v8 }
  0xc2   :  { %v197_v45 = vmul.f32 %v1470_v1, %v176_v4  ;;  %v200_v46 = vmul.f32 %v1473_v3, %v170_v40  ;;  %v193_v48 = vmul.f32 %v1470_v1, %v175_v41  ;;  %v196_v49 = vmul.f32 %v1473_v3, %v169_v5 }
  0xc4   :  { %v102_v50 = vpop.permute.xlu1 %101  ;;  %v100_v51 = vpop.permute.xlu0 %99  ;;  %v201_v52 = vpack.c.bf16 %v197_v45, %v193_v48  ;;  %v204_v53 = vpack.c.bf16 %v200_v46, %v196_v49  ;;  %v1530_v49 = vrot.slane %v1259_v15, %v73_v35 }
  0xc6   :  { %508 = vmatpush1.bf16.msra.mxu0 %v201_v52  ;;  %550 = vmatprep.subr.bf16.mxu1 %v204_v53  ;;  %2167 = vst [vmem:[#allocation7_spill] sm:$0xff] %v1530_v49 }
  0xc7   :  { %551 = vmatpush1.bf16.msra.mxu1 %v203_v54 }
  0xc8   :  { %v106_v59 = vpop.permute.xlu1 %105  ;;  %v104_v61 = vpop.permute.xlu0 %103 }
  0xc9   :  { %v121_v62 = vsel %vm115_vm6, %v102_v50, %v106_v59  ;;  %v120_v63 = vsel %vm115_vm6, %v100_v51, %v104_v61 }
  0xca   :  { %v145_v8 = vmul.f32 %v1492_v55, %v121_v62  ;;  %v141_v10 = vmul.f32 %v1492_v55, %v120_v63  ;;  %v1539_v62 = vrot.slane %v1289_v23, %v73_v35 }
  0xcc   :  { %v110_v12 = vpop.permute.xlu1 %109  ;;  %v108_v19 = vpop.permute.xlu0 %107  ;;  %v149_v24 = vpack.c.bf16 %v145_v8, %v141_v10  ;;  %2168 = vst [vmem:[#allocation8_spill] sm:$0xff] %v1539_v62 }
  0xcd   :  { %v119_v25 = vsel %vm115_vm6, %v106_v59, %v110_v12  ;;  %v118_v26 = vsel %vm115_vm6, %v104_v61, %v108_v19 }
  0xce   :  { %509 = vmatprep.subr.bf16.mxu0 %v149_v24  ;;  %v146_v27 = vmul.f32 %v1501_v13, %v119_v25  ;;  %v142_v29 = vmul.f32 %v1501_v13, %v118_v26 }
  0xd0   :  { %v114_v30 = vpop.permute.xlu1 %113  ;;  %v112_v33 = vpop.permute.xlu0 %111  ;;  %v150_v48 = vpack.c.bf16 %v146_v27, %v142_v29 }
  0xd1   :  { %v117_v36 = vsel %vm115_vm6, %v110_v12, %v114_v30  ;;  %v123_v6 = vsel %vm115_vm6, %v114_v30, %v102_v50  ;;  %v116_v7 = vsel %vm115_vm6, %v108_v19, %v112_v33  ;;  %v122_v37 = vsel %vm115_vm6, %v112_v33, %v100_v51 }
  0xd2   :  { %v144_v38 = vmul.f32 %v1508_v0, %v123_v6  ;;  %v147_v40 = vmul.f32 %v1511_v2, %v117_v36  ;;  %v140_v4 = vmul.f32 %v1508_v0, %v122_v37  ;;  %v143_v9 = vmul.f32 %v1511_v2, %v116_v7 }
  0xd3   :  { %v1546_v12 = vrot.slane %v1264_v16, %v73_v35  ;;  %v1549_v19 = vrot.slane %v1284_v22, %v73_v35 }
  0xd4   :  { %v47_v5 = vpop.permute.xlu1 %46  ;;  %v45_v41 = vpop.permute.xlu0 %44  ;;  %v148_v45 = vpack.c.bf16 %v144_v38, %v140_v4  ;;  %v151_v46 = vpack.c.bf16 %v147_v40, %v143_v9 }
  0xd5   :  { %2169 = vst [vmem:[#allocation9_spill] sm:$0xff] %v1546_v12  ;;  %2170 = vst [vmem:[#allocation10_spill] sm:$0xff] %v1549_v19 }
  0xd6   :  { %510 = vmatpush1.bf16.msra.mxu0 %v148_v45  ;;  %552 = vmatprep.subr.bf16.mxu1 %v151_v46  ;;  %v1578_v46 = vld [vmem:[%s2119_s0 + $0x28] ss:$0 sm:$0xff] }
  0xd7   :  { %553 = vmatpush1.bf16.msra.mxu1 %v150_v48  ;;  %2172 = vst [vmem:[#allocation12_spill] sm:$0xff] %v1578_v46 }
  0xd8   :  { %v51_v50 = vpop.permute.xlu1 %50  ;;  %v49_v51 = vpop.permute.xlu0 %48 }
  0xd9   :  { %v68_v52 = vsel %vm62_vm7, %v47_v5, %v51_v50  ;;  %v67_v53 = vsel %vm62_vm7, %v45_v41, %v49_v51 }
  0xda   :  { %v92_v54 = vmul.f32 %v1530_v49, %v68_v52  ;;  %v88_v59 = vmul.f32 %v1530_v49, %v67_v53 }
  0xdc   :  { %v55_v61 = vpop.permute.xlu1 %54  ;;  %v53_v63 = vpop.permute.xlu0 %52  ;;  %v96_v15 = vpack.c.bf16 %v92_v54, %v88_v59 }
  0xdd   :  { %v66_v8 = vsel %vm62_vm7, %v51_v50, %v55_v61  ;;  %v65_v10 = vsel %vm62_vm7, %v49_v51, %v53_v63 }
  0xde   :  { %511 = vmatprep.subr.bf16.mxu0 %v96_v15  ;;  %v93_v24 = vmul.f32 %v1539_v62, %v66_v8  ;;  %v89_v23 = vmul.f32 %v1539_v62, %v65_v10  ;;  %v1596_v15 = vld [vmem:[%s2119_s0 + $0x38] ss:$0 sm:$0xff] }
  0xdf   :  { %2174 = vst [vmem:[#allocation14_spill] sm:$0xff] %v1596_v15 }
  0xe0   :  { %v59_v25 = vpop.permute.xlu1 %58  ;;  %v57_v26 = vpop.permute.xlu0 %56  ;;  %v97_v40 = vpack.c.bf16 %v93_v24, %v89_v23 }
  0xe1   :  { %v64_v27 = vsel %vm62_vm7, %v55_v61, %v59_v25  ;;  %v70_v29 = vsel %vm62_vm7, %v59_v25, %v47_v5  ;;  %v63_v30 = vsel %vm62_vm7, %v53_v63, %v57_v26  ;;  %v69_v16 = vsel %vm62_vm7, %v57_v26, %v45_v41  ;;  %v1569_v5 = vld [vmem:[%s2119_s0 + $0x20] ss:$0 sm:$0xff]  ;;  %v1591_v63 = vld [vmem:[%s2119_s0 + $0x30] ss:$0 sm:$0xff] }
  0xe2   :  { %v91_v22 = vmul.f32 %v1546_v12, %v70_v29  ;;  %v94_v33 = vmul.f32 %v1549_v19, %v64_v27  ;;  %v87_v35 = vmul.f32 %v1546_v12, %v69_v16  ;;  %v90_v36 = vmul.f32 %v1549_v19, %v63_v30  ;;  %2171 = vst [vmem:[#allocation11_spill] sm:$0xff] %v1569_v5 }
  0xe3   :  { %2173 = vst [vmem:[#allocation13_spill] sm:$0xff] %v1591_v63 }
  0xe4   :  { %v424_v6 = vpop.permute.xlu1 %423  ;;  %v422_v7 = vpop.permute.xlu0 %421  ;;  %v95_v37 = vpack.c.bf16 %v91_v22, %v87_v35  ;;  %v98_v38 = vpack.c.bf16 %v94_v33, %v90_v36  ;;  %v1038_v35 = vld [vmem:[%s2118_s2] ss:$8 sps:$4 sm:$0xff]  }
  0xe6   :  { %512 = vmatpush1.bf16.msra.mxu0 %v95_v37  ;;  %554 = vmatprep.subr.bf16.mxu1 %v98_v38 }
  0xe7   :  { %555 = vmatpush1.bf16.msra.mxu1 %v97_v40 }
  0xe8   :  { %v428_v4 = vpop.permute.xlu1 %427  ;;  %v426_v9 = vpop.permute.xlu0 %425 }
  0xe9   :  { %v443_v41 = vsel %vm437_vm8, %v424_v6, %v428_v4  ;;  %v442_v45 = vsel %vm437_vm8, %v422_v7, %v426_v9 }
  0xea   :  { %v466_v48 = vmul.f32 %v1569_v5, %v443_v41  ;;  %v462_v50 = vmul.f32 %v1569_v5, %v442_v45 }
  0xec   :  { %v432_v51 = vpop.permute.xlu1 %431  ;;  %v430_v52 = vpop.permute.xlu0 %429  ;;  %v470_v23 = vpack.c.bf16 %v466_v48, %v462_v50 }
  0xed   :  { %v441_v53 = vsel %vm437_vm8, %v428_v4, %v432_v51  ;;  %v440_v54 = vsel %vm437_vm8, %v426_v9, %v430_v52 }
  0xee   :  { %v467_v59 = vmul.f32 %v1578_v46, %v441_v53  ;;  %v463_v61 = vmul.f32 %v1578_v46, %v440_v54 }
  0xf0   :  { %v436_v8 = vpop.permute.xlu1 %435  ;;  %v434_v10 = vpop.permute.xlu0 %433  ;;  %v471_v24 = vpack.c.bf16 %v467_v59, %v463_v61 }
  0xf1   :  { %v439_v25 = vsel %vm437_vm8, %v432_v51, %v436_v8  ;;  %v445_v26 = vsel %vm437_vm8, %v436_v8, %v424_v6  ;;  %v438_v27 = vsel %vm437_vm8, %v430_v52, %v434_v10  ;;  %v444_v29 = vsel %vm437_vm8, %v434_v10, %v422_v7 }
  0xf2   :  { %v468_v30 = vmul.f32 %v1591_v63, %v439_v25  ;;  %v469_v16 = vmul.f32 %v1596_v15, %v445_v26  ;;  %v464_v22 = vmul.f32 %v1591_v63, %v438_v27  ;;  %v465_v33 = vmul.f32 %v1596_v15, %v444_v29  ;;  %527 = vmatprep.subr.bf16.mxu0 %v471_v24 }
  0xf3   :  { %528 = vmatpush2.bf16.msra.mxu0 %v470_v23 }
  0xf4   :  { %v473_v36 = vpack.c.bf16 %v469_v16, %v465_v33  ;;  %v472_v6 = vpack.c.bf16 %v468_v30, %v464_v22 }
  0xf6   :  { %530 = vmatmul.mubr.bf16.vlgmr.msra.gmra.mxu0 %v1038_v35  ;;  %570 = vmatprep.subr.bf16.mxu1 %v473_v36 }
  0xf7   :  { %571 = vmatpush2.bf16.msra.mxu1 %v472_v6 }
  0xfa   :  { %573 = vmatmul.mubr.bf16.vlgmr.msra.gmra.mxu1 %v1038_v35 }
  0xfe   :  { %v477_v7 = vpop.permute.xlu0 %476 }
  0xff   :  { %v482_v4 = vpop.permute.xlu1 %481 }
 0x1b6   :  { %v531_v37 = vpop.f32.mrf.mxu0 }
 0x1b7   :  { %v532_v38 = vadd.f32 %v531_v37, %v477_v7 }
 0x1b8   :  { %v533_v40 = vpop.f32.mrf.mxu0 }
 0x1b9   :  { %v1613_v9 = vmax.f32 %v532_v38, 0.0  ;;  %v534_v24 = vadd.f32 %v533_v40, %v477_v7  ;;  %v593_v40 = vld [vmem:[%s2122_s5] sm:$0xff] }
 0x1ba   :  { %v535_v41 = vpop.f32.mrf.mxu0  ;;  %v574_v45 = vpop.f32.mrf.mxu1 }
 0x1bb   :  { %v536_v48 = vadd.f32 %v535_v41, %v482_v4  ;;  %v575_v50 = vadd.f32 %v574_v45, %v477_v7  ;;  %815 = vrot.lane.b32.xlu1 %v1613_v9, %s1044_s25  ;;  %v1687_v25 = vmax.f32 %v534_v24, 0.0  ;;  %v594_v45 = vld [vmem:[%s2122_s5 + $0x8] sm:$0xff] }
 0x1bc   :  { %v576_v51 = vpop.f32.mrf.mxu1  ;;  %v537_v23 = vpop.f32.mrf.mxu0 }
 0x1bd   :  { %v1617_v52 = vmax.f32 %v536_v48, 0.0  ;;  %v1619_v53 = vmax.f32 %v575_v50, 0.0  ;;  %v538_v26 = vadd.f32 %v537_v23, %v482_v4  ;;  %v577_v27 = vadd.f32 %v576_v51, %v477_v7  ;;  %v1041_v7 = vld [vmem:[%s2121_s4 + $0x4] ss:$8 sps:$4 sm:$0xff]  }
 0x1be   :  { %v578_v54 = vpop.f32.mrf.mxu1  ;;  %1025 = vmatprep.mubr.msk.bf16.mxu0 %vm493_vm0, %v1041_v7  ;;  %1026 = vmatprep.mubr.msk.bf16.mxu1 %vm493_vm0, %v1041_v7 }
 0x1bf   :  { %v579_v59 = vadd.f32 %v578_v54, %v482_v4  ;;  %817 = vrot.lane.b32.xlu0 %v1617_v52, %s1044_s25  ;;  %823 = vrot.lane.b32.xlu1 %v1619_v53, %s1044_s25  ;;  %v1693_v30 = vmax.f32 %v538_v26, 0.0  ;;  %v1695_v16 = vmax.f32 %v577_v27, 0.0 }
 0x1c0   :  { %v580_v29 = vpop.f32.mrf.mxu1 }
 0x1c1   :  { %v1627_v8 = vmax.f32 %v579_v59, 0.0  ;;  %v581_v22 = vadd.f32 %v580_v29, %v482_v4 }
 0x1c3   :  { %825 = vrot.lane.b32.xlu0 %v1627_v8, %s1044_s25  ;;  %779 = vrot.lane.b32.xlu1 %v1613_v9, %s1045_s14  ;;  %v1701_v33 = vmax.f32 %v581_v22, 0.0 }
 0x1c7   :  { %781 = vrot.lane.b32.xlu0 %v1617_v52, %s1045_s14  ;;  %787 = vrot.lane.b32.xlu1 %v1619_v53, %s1045_s14 }
 0x1cb   :  { %789 = vrot.lane.b32.xlu0 %v1627_v8, %s1045_s14  ;;  %743 = vrot.lane.b32.xlu1 %v1613_v9, %s1046_s1 }
 0x1cf   :  { %745 = vrot.lane.b32.xlu0 %v1617_v52, %s1046_s1  ;;  %751 = vrot.lane.b32.xlu1 %v1619_v53, %s1046_s1 }
 0x1d3   :  { %753 = vrot.lane.b32.xlu0 %v1627_v8, %s1046_s1  ;;  %703 = vrot.lane.b32.xlu1 %v1613_v9, %s1047_s15 }
 0x1d7   :  { %705 = vrot.lane.b32.xlu0 %v1617_v52, %s1047_s15  ;;  %711 = vrot.lane.b32.xlu1 %v1619_v53, %s1047_s15 }
 0x1db   :  { %713 = vrot.lane.b32.xlu0 %v1627_v8, %s1047_s15  ;;  %667 = vrot.lane.b32.xlu1 %v1613_v9, %s1048_s16 }
 0x1df   :  { %669 = vrot.lane.b32.xlu0 %v1617_v52, %s1048_s16  ;;  %675 = vrot.lane.b32.xlu1 %v1619_v53, %s1048_s16 }
 0x1e3   :  { %677 = vrot.lane.b32.xlu0 %v1627_v8, %s1048_s16  ;;  %631 = vrot.lane.b32.xlu1 %v1613_v9, %s1049_s17 }
 0x1e7   :  { %633 = vrot.lane.b32.xlu0 %v1617_v52, %s1049_s17  ;;  %639 = vrot.lane.b32.xlu1 %v1619_v53, %s1049_s17 }
 0x1eb   :  { %641 = vrot.lane.b32.xlu0 %v1627_v8, %s1049_s17  ;;  %595 = vrot.lane.b32.xlu1 %v1613_v9, %s1050_s18 }
 0x1ef   :  { %597 = vrot.lane.b32.xlu0 %v1617_v52, %s1050_s18  ;;  %603 = vrot.lane.b32.xlu1 %v1619_v53, %s1050_s18 }
 0x1f3   :  { %605 = vrot.lane.b32.xlu0 %v1627_v8, %s1050_s18  ;;  %851 = vrot.lane.b32.xlu1 %v1613_v9, %s1051_s19 }
 0x1f7   :  { %853 = vrot.lane.b32.xlu0 %v1617_v52, %s1051_s19  ;;  %859 = vrot.lane.b32.xlu1 %v1619_v53, %s1051_s19 }
 0x1fb   :  { %861 = vrot.lane.b32.xlu0 %v1627_v8, %s1051_s19  ;;  %819 = vrot.lane.b32.xlu1 %v1687_v25, %s1044_s25 }
 0x1ff   :  { %821 = vrot.lane.b32.xlu0 %v1693_v30, %s1044_s25  ;;  %827 = vrot.lane.b32.xlu1 %v1695_v16, %s1044_s25 }
 0x203   :  { %829 = vrot.lane.b32.xlu0 %v1701_v33, %s1044_s25  ;;  %783 = vrot.lane.b32.xlu1 %v1687_v25, %s1045_s14 }
 0x207   :  { %785 = vrot.lane.b32.xlu0 %v1693_v30, %s1045_s14  ;;  %791 = vrot.lane.b32.xlu1 %v1695_v16, %s1045_s14 }
 0x20b   :  { %793 = vrot.lane.b32.xlu0 %v1701_v33, %s1045_s14  ;;  %747 = vrot.lane.b32.xlu1 %v1687_v25, %s1046_s1 }
 0x20f   :  { %749 = vrot.lane.b32.xlu0 %v1693_v30, %s1046_s1  ;;  %755 = vrot.lane.b32.xlu1 %v1695_v16, %s1046_s1 }
 0x213   :  { %757 = vrot.lane.b32.xlu0 %v1701_v33, %s1046_s1  ;;  %707 = vrot.lane.b32.xlu1 %v1687_v25, %s1047_s15 }
 0x217   :  { %709 = vrot.lane.b32.xlu0 %v1693_v30, %s1047_s15  ;;  %715 = vrot.lane.b32.xlu1 %v1695_v16, %s1047_s15 }
 0x21b   :  { %717 = vrot.lane.b32.xlu0 %v1701_v33, %s1047_s15  ;;  %671 = vrot.lane.b32.xlu1 %v1687_v25, %s1048_s16 }
 0x21f   :  { %673 = vrot.lane.b32.xlu0 %v1693_v30, %s1048_s16  ;;  %679 = vrot.lane.b32.xlu1 %v1695_v16, %s1048_s16 }
 0x223   :  { %681 = vrot.lane.b32.xlu0 %v1701_v33, %s1048_s16  ;;  %635 = vrot.lane.b32.xlu1 %v1687_v25, %s1049_s17 }
 0x227   :  { %637 = vrot.lane.b32.xlu0 %v1693_v30, %s1049_s17  ;;  %643 = vrot.lane.b32.xlu1 %v1695_v16, %s1049_s17 }
 0x22b   :  { %645 = vrot.lane.b32.xlu0 %v1701_v33, %s1049_s17  ;;  %599 = vrot.lane.b32.xlu1 %v1687_v25, %s1050_s18 }
 0x22d   :  { %v816_v35 = vpop.permute.xlu1 %815 }
 0x22f   :  { %601 = vrot.lane.b32.xlu0 %v1693_v30, %s1050_s18  ;;  %607 = vrot.lane.b32.xlu1 %v1695_v16, %s1050_s18 }
 0x231   :  { %v1751_v36 = vpop.permute.xlu0 %817  ;;  %v824_v6 = vpop.permute.xlu1 %823 }
 0x233   :  { %609 = vrot.lane.b32.xlu0 %v1701_v33, %s1050_s18  ;;  %855 = vrot.lane.b32.xlu1 %v1687_v25, %s1051_s19 }
 0x235   :  { %v826_v37 = vpop.permute.xlu0 %825  ;;  %v1762_v38 = vpop.permute.xlu1 %779 }
 0x237   :  { %857 = vrot.lane.b32.xlu0 %v1693_v30, %s1051_s19  ;;  %863 = vrot.lane.b32.xlu1 %v1695_v16, %s1051_s19 }
 0x239   :  { %v1771_v4 = vpop.permute.xlu0 %781  ;;  %v1773_v41 = vpop.permute.xlu1 %787 }
 0x23b   :  { %865 = vrot.lane.b32.xlu0 %v1701_v33, %s1051_s19  ;;  %889 = vperm.xlu1 %1037, %v593_v40  }
 0x23d   :  { %v1780_v48 = vpop.permute.xlu0 %789  ;;  %v1782_v50 = vpop.permute.xlu1 %743 }
 0x23f   :  { %894 = vperm.xlu0 %1036, %v594_v45  }
 0x241   :  { %v1784_v51 = vpop.permute.xlu0 %745  ;;  %v1786_v54 = vpop.permute.xlu1 %751 }
 0x245   :  { %v1788_v59 = vpop.permute.xlu0 %753  ;;  %v1790_v24 = vpop.permute.xlu1 %703 }
 0x249   :  { %v1792_v23 = vpop.permute.xlu0 %705  ;;  %v1794_v26 = vpop.permute.xlu1 %711 }
 0x24d   :  { %v1796_v27 = vpop.permute.xlu0 %713  ;;  %v1798_v29 = vpop.permute.xlu1 %667 }
 0x251   :  { %v1800_v22 = vpop.permute.xlu0 %669  ;;  %v1802_v7 = vpop.permute.xlu1 %675 }
 0x255   :  { %v1804_v40 = vpop.permute.xlu0 %677  ;;  %v1806_v45 = vpop.permute.xlu1 %631 }
 0x256   :  { %2175 = vst [vmem:[#allocation15_spill] sm:$0xff] %v1806_v45 }
 0x259   :  { %v1808_v10 = vpop.permute.xlu0 %633  ;;  %v1810_v61 = vpop.permute.xlu1 %639 }
 0x25a   :  { %2176 = vst [vmem:[#allocation16_spill] sm:$0xff] %v1808_v10  ;;  %2177 = vst [vmem:[#allocation17_spill] sm:$0xff] %v1810_v61 }
 0x25d   :  { %v1812_v15 = vpop.permute.xlu0 %641  ;;  %v1814_v63 = vpop.permute.xlu1 %595 }
 0x25e   :  { %2178 = vst [vmem:[#allocation18_spill] sm:$0xff] %v1812_v15  ;;  %2179 = vst [vmem:[#allocation19_spill] sm:$0xff] %v1814_v63 }
 0x261   :  { %v1816_v46 = vpop.permute.xlu0 %597  ;;  %v1818_v5 = vpop.permute.xlu1 %603 }
 0x262   :  { %2180 = vst [vmem:[#allocation20_spill] sm:$0xff] %v1816_v46  ;;  %2181 = vst [vmem:[#allocation21_spill] sm:$0xff] %v1818_v5 }
 0x265   :  { %v1820_v19 = vpop.permute.xlu0 %605  ;;  %v1822_v12 = vpop.permute.xlu1 %851 }
 0x266   :  { %2182 = vst [vmem:[#allocation22_spill] sm:$0xff] %v1820_v19  ;;  %2183 = vst [vmem:[#allocation23_spill] sm:$0xff] %v1822_v12 }
 0x269   :  { %v1824_v62 = vpop.permute.xlu0 %853  ;;  %v1826_v49 = vpop.permute.xlu1 %859 }
 0x26a   :  { %2184 = vst [vmem:[#allocation24_spill] sm:$0xff] %v1824_v62  ;;  %2185 = vst [vmem:[#allocation25_spill] sm:$0xff] %v1826_v49 }
 0x26d   :  { %v1828_v2 = vpop.permute.xlu0 %861  ;;  %v820_v0 = vpop.permute.xlu1 %819 }
 0x26e   :  { %2186 = vst [vmem:[#allocation26_spill] sm:$0xff] %v1828_v2  ;;  %v833_v13 = vsel %vm384_vm1, %v820_v0, %v824_v6  ;;  %v835_v63 = vsel %vm384_vm1, %v816_v35, %v820_v0 }
 0x26f   :  { %v839_v12 = vmul.f32 %v835_v63, %v1279_v21  ;;  %v840_v2 = vmul.f32 %v833_v13, %v1276_v20 }
 0x271   :  { %v822_v46 = vpop.permute.xlu0 %821  ;;  %v828_v55 = vpop.permute.xlu1 %827 }
 0x272   :  { %v834_v19 = vsel %vm384_vm1, %v822_v46, %v826_v37  ;;  %v836_v62 = vsel %vm384_vm1, %v1751_v36, %v822_v46  ;;  %v831_v0 = vsel %vm384_vm1, %v824_v6, %v828_v55  ;;  %v837_v10 = vsel %vm384_vm1, %v828_v55, %v816_v35 }
 0x273   :  { %v843_v49 = vmul.f32 %v836_v62, %v1279_v21  ;;  %v844_v5 = vmul.f32 %v834_v19, %v1276_v20  ;;  %v841_v21 = vmul.f32 %v831_v0, %v1302_v32  ;;  %v842_v20 = vmul.f32 %v837_v10, %v1299_v31 }
 0x275   :  { %v847_v15 = vpack.c.bf16 %v843_v49, %v839_v12  ;;  %v830_v45 = vpop.permute.xlu0 %829  ;;  %v784_v61 = vpop.permute.xlu1 %783  ;;  %v848_v3 = vpack.c.bf16 %v844_v5, %v840_v2 }
 0x276   :  { %v832_v46 = vsel %vm384_vm1, %v826_v37, %v830_v45  ;;  %v838_v13 = vsel %vm384_vm1, %v830_v45, %v1751_v36  ;;  %v797_v55 = vsel %vm331_vm2, %v784_v61, %v1773_v41  ;;  %v799_v2 = vsel %vm331_vm2, %v1762_v38, %v784_v61 }
 0x277   :  { %v845_v62 = vmul.f32 %v832_v46, %v1302_v32  ;;  %v846_v19 = vmul.f32 %v838_v13, %v1299_v31  ;;  %909 = vmatprep.subr.bf16.mxu0 %v848_v3  ;;  %v803_v3 = vmul.f32 %v799_v2, %v1332_v56  ;;  %v804_v10 = vmul.f32 %v797_v55, %v1339_v60 }
 0x278   :  { %910 = vmatpush1.bf16.msra.mxu0 %v847_v15 }
 0x279   :  { %v849_v49 = vpack.c.bf16 %v845_v62, %v841_v21  ;;  %v786_v12 = vpop.permute.xlu0 %785  ;;  %v792_v5 = vpop.permute.xlu1 %791  ;;  %v850_v63 = vpack.c.bf16 %v846_v19, %v842_v20 }
 0x27a   :  { %v798_v32 = vsel %vm331_vm2, %v786_v12, %v1780_v48  ;;  %v800_v31 = vsel %vm331_vm2, %v1771_v4, %v786_v12  ;;  %v795_v61 = vsel %vm331_vm2, %v1773_v41, %v792_v5  ;;  %v801_v36 = vsel %vm331_vm2, %v792_v5, %v1762_v38 }
 0x27b   :  { %v807_v35 = vmul.f32 %v800_v31, %v1332_v56  ;;  %v808_v15 = vmul.f32 %v798_v32, %v1339_v60  ;;  %952 = vmatprep.subr.bf16.mxu1 %v850_v63  ;;  %v805_v46 = vmul.f32 %v795_v61, %v1350_v17  ;;  %v806_v41 = vmul.f32 %v801_v36, %v1353_v18 }
 0x27c   :  { %953 = vmatpush1.bf16.msra.mxu1 %v849_v49 }
 0x27d   :  { %v811_v6 = vpack.c.bf16 %v807_v35, %v803_v3  ;;  %v794_v37 = vpop.permute.xlu0 %793  ;;  %v748_v45 = vpop.permute.xlu1 %747  ;;  %v812_v0 = vpack.c.bf16 %v808_v15, %v804_v10 }
 0x27e   :  { %v796_v56 = vsel %vm331_vm2, %v1780_v48, %v794_v37  ;;  %v802_v60 = vsel %vm331_vm2, %v794_v37, %v1771_v4  ;;  %v761_v21 = vsel %vm278_vm3, %v748_v45, %v1786_v54  ;;  %v763_v48 = vsel %vm278_vm3, %v1782_v50, %v748_v45 }
 0x27f   :  { %v809_v13 = vmul.f32 %v796_v56, %v1350_v17  ;;  %v810_v38 = vmul.f32 %v802_v60, %v1353_v18  ;;  %911 = vmatprep.subr.bf16.mxu0 %v812_v0  ;;  %v767_v55 = vmul.f32 %v763_v48, %v1370_v43  ;;  %v768_v2 = vmul.f32 %v761_v21, %v1377_v47 }
 0x280   :  { %912 = vmatpush1.bf16.msra.mxu0 %v811_v6  ;;  %v742_v37 = vpack.c.bf16 %v1701_v33, %v1695_v16  ;;  %v2187_v16 = vpack.c.bf16 %v1617_v52, %v1613_v9 }
 0x281   :  { %v813_v20 = vpack.c.bf16 %v809_v13, %v805_v46  ;;  %v750_v4 = vpop.permute.xlu0 %749  ;;  %v756_v62 = vpop.permute.xlu1 %755  ;;  %v814_v19 = vpack.c.bf16 %v810_v38, %v806_v41 }
 0x282   :  { %v762_v17 = vsel %vm278_vm3, %v750_v4, %v1788_v59  ;;  %v764_v18 = vsel %vm278_vm3, %v1784_v51, %v750_v4  ;;  %v759_v5 = vsel %vm278_vm3, %v1786_v54, %v756_v62  ;;  %v765_v63 = vsel %vm278_vm3, %v756_v62, %v1782_v50 }
 0x283   :  { %v771_v49 = vmul.f32 %v764_v18, %v1370_v43  ;;  %v772_v12 = vmul.f32 %v762_v17, %v1377_v47  ;;  %954 = vmatprep.subr.bf16.mxu1 %v814_v19  ;;  %v740_v54 = vpack.c.bf16 %v1693_v30, %v1687_v25  ;;  %v769_v35 = vmul.f32 %v759_v5, %v1388_v57 }
 0x284   :  { %955 = vmatpush1.bf16.msra.mxu1 %v813_v20  ;;  %v770_v50 = vmul.f32 %v765_v63, %v1391_v58 }
 0x285   :  { %v775_v32 = vpack.c.bf16 %v771_v49, %v767_v55  ;;  %v758_v31 = vpop.permute.xlu0 %757  ;;  %v708_v3 = vpop.permute.xlu1 %707  ;;  %v776_v10 = vpack.c.bf16 %v772_v12, %v768_v2 }
 0x286   :  { %v760_v43 = vsel %vm278_vm3, %v1788_v59, %v758_v31  ;;  %v766_v47 = vsel %vm278_vm3, %v758_v31, %v1784_v51  ;;  %v721_v59 = vsel %vm221_vm4, %v708_v3, %v1794_v26  ;;  %v723_v51 = vsel %vm221_vm4, %v1790_v24, %v708_v3 }
 0x287   :  { %v773_v15 = vmul.f32 %v760_v43, %v1388_v57  ;;  %v774_v61 = vmul.f32 %v766_v47, %v1391_v58  ;;  %913 = vmatprep.subr.bf16.mxu0 %v776_v10  ;;  %v728_v45 = vmul.f32 %v723_v51, %v1414_v34  ;;  %v729_v0 = vmul.f32 %v721_v59, %v1425_v39  ;;  %v2190_v10 = vld [vmem:[#allocation17_spill] sm:$0xff]  ;;  %v2191_v47 = vld [vmem:[#allocation15_spill] sm:$0xff] }
 0x288   :  { %914 = vmatpush1.bf16.msra.mxu0 %v775_v32  ;;  %v2189_v32 = vld [vmem:[#allocation2_spill] sm:$0xff]  ;;  %v2194_v51 = vld [vmem:[#allocation3_spill] sm:$0xff] }
 0x289   :  { %v777_v36 = vpack.c.bf16 %v773_v15, %v769_v35  ;;  %v710_v25 = vpop.permute.xlu0 %709  ;;  %915 = vmatprep.subr.bf16.mxu0 %v740_v54  ;;  %v716_v30 = vpop.permute.xlu1 %715  ;;  %v778_v6 = vpack.c.bf16 %v774_v61, %v770_v50  ;;  %v2192_v15 = vld [vmem:[#allocation18_spill] sm:$0xff] }
 0x28a   :  { %v722_v57 = vsel %vm221_vm4, %v710_v25, %v1796_v27  ;;  %v724_v58 = vsel %vm221_vm4, %v1792_v23, %v710_v25  ;;  %v719_v46 = vsel %vm221_vm4, %v1794_v26, %v716_v30  ;;  %v725_v41 = vsel %vm221_vm4, %v716_v30, %v1790_v24  ;;  %v2195_v25 = vld [vmem:[#allocation4_spill] sm:$0xff] }
 0x28b   :  { %v732_v56 = vmul.f32 %v724_v58, %v1414_v34  ;;  %v733_v60 = vmul.f32 %v722_v57, %v1425_v39  ;;  %956 = vmatprep.subr.bf16.mxu1 %v778_v6  ;;  %v727_v24 = vmul.f32 %v725_v41, %v1432_v42  ;;  %v730_v21 = vmul.f32 %v719_v46, %v1435_v44 }
 0x28c   :  { %916 = vmatpush1.bf16.msra.mxu0 %v2187_v16  ;;  %957 = vmatpush1.bf16.msra.mxu1 %v777_v36  ;;  %v2196_v16 = vld [vmem:[#allocation5_spill] sm:$0xff] }
 0x28d   :  { %v737_v33 = vpack.c.bf16 %v733_v60, %v729_v0  ;;  %v718_v13 = vpop.permute.xlu0 %717  ;;  %958 = vmatprep.subr.bf16.mxu1 %v742_v37  ;;  %v672_v34 = vpop.permute.xlu1 %671  ;;  %v736_v38 = vpack.c.bf16 %v732_v56, %v728_v45 }
 0x28e   :  { %v720_v39 = vsel %vm221_vm4, %v1796_v27, %v718_v13  ;;  %v726_v26 = vsel %vm221_vm4, %v718_v13, %v1792_v23  ;;  %v685_v48 = vsel %vm168_vm5, %v672_v34, %v1802_v7  ;;  %v687_v27 = vsel %vm168_vm5, %v1798_v29, %v672_v34  ;;  %v2197_v13 = vld [vmem:[#allocation6_spill] sm:$0xff] }
 0x28f   :  { %v731_v9 = vmul.f32 %v726_v26, %v1432_v42  ;;  %v734_v52 = vmul.f32 %v720_v39, %v1435_v44  ;;  %917 = vmatprep.subr.bf16.mxu0 %v736_v38  ;;  %v2188_v23 = vpack.c.bf16 %v1627_v8, %v1619_v53  ;;  %v692_v17 = vmul.f32 %v687_v27, %v1454_v14  ;;  %v2198_v26 = vld [vmem:[#allocation21_spill] sm:$0xff] }
 0x290   :  { %v693_v18 = vmul.f32 %v685_v48, %v1463_v28 }
 0x291   :  { %959 = vmatpush1.bf16.msra.mxu1 %v2188_v23  ;;  %v735_v20 = vpack.c.bf16 %v731_v9, %v727_v24  ;;  %v674_v4 = vpop.permute.xlu0 %673  ;;  %v680_v62 = vpop.permute.xlu1 %679  ;;  %v738_v19 = vpack.c.bf16 %v734_v52, %v730_v21  ;;  %v2199_v21 = vld [vmem:[#allocation19_spill] sm:$0xff] }
 0x292   :  { %v686_v42 = vsel %vm168_vm5, %v674_v4, %v1804_v40  ;;  %v688_v44 = vsel %vm168_vm5, %v1800_v22, %v674_v4  ;;  %v683_v8 = vsel %vm168_vm5, %v1802_v7, %v680_v62  ;;  %v689_v2 = vsel %vm168_vm5, %v680_v62, %v1798_v29  ;;  %v2201_v62 = vld [vmem:[#allocation20_spill] sm:$0xff] }
 0x293   :  { %v696_v55 = vmul.f32 %v688_v44, %v1454_v14  ;;  %v697_v53 = vmul.f32 %v686_v42, %v1463_v28  ;;  %918 = vmatpush1.bf16.msra.mxu0 %v735_v20  ;;  %960 = vmatprep.subr.bf16.mxu1 %v738_v19  ;;  %v691_v7 = vmul.f32 %v689_v2, %v1470_v1  ;;  %v2200_v20 = vld [vmem:[#allocation22_spill] sm:$0xff]  ;;  %v2202_v42 = vld [vmem:[#allocation7_spill] sm:$0xff] }
 0x294   :  { %v694_v31 = vmul.f32 %v683_v8, %v2189_v32 }
 0x295   :  { %v701_v49 = vpack.c.bf16 %v697_v53, %v693_v18  ;;  %961 = vmatpush1.bf16.msra.mxu1 %v737_v33  ;;  %v682_v12 = vpop.permute.xlu0 %681  ;;  %v636_v5 = vpop.permute.xlu1 %635  ;;  %v700_v63 = vpack.c.bf16 %v696_v55, %v692_v17  ;;  %v2203_v17 = vld [vmem:[#allocation8_spill] sm:$0xff] }
 0x296   :  { %v684_v14 = vsel %vm168_vm5, %v1804_v40, %v682_v12  ;;  %v690_v28 = vsel %vm168_vm5, %v682_v12, %v1800_v22  ;;  %v649_v43 = vsel %vm115_vm6, %v636_v5, %v2190_v10  ;;  %v651_v40 = vsel %vm115_vm6, %v2191_v47, %v636_v5 }
 0x297   :  { %v695_v29 = vmul.f32 %v690_v28, %v1470_v1  ;;  %v698_v3 = vmul.f32 %v684_v14, %v2189_v32  ;;  %919 = vmatprep.subr.bf16.mxu0 %v700_v63  ;;  %v2193_v1 = vld [vmem:[#allocation16_spill] sm:$0xff]  ;;  %v656_v36 = vmul.f32 %v651_v40, %v2194_v51  ;;  %v657_v30 = vmul.f32 %v649_v43, %v2195_v25  ;;  %v2206_v43 = vld [vmem:[#allocation25_spill] sm:$0xff]  ;;  %v2207_v40 = vld [vmem:[#allocation23_spill] sm:$0xff] }
 0x299   :  { %v699_v54 = vpack.c.bf16 %v695_v29, %v691_v7  ;;  %v638_v35 = vpop.permute.xlu0 %637  ;;  %v644_v22 = vpop.permute.xlu1 %643  ;;  %v702_v50 = vpack.c.bf16 %v698_v3, %v694_v31  ;;  %v2204_v7 = vld [vmem:[#allocation9_spill] sm:$0xff]  ;;  %v2205_v31 = vld [vmem:[#allocation10_spill] sm:$0xff] }
 0x29a   :  { %v650_v61 = vsel %vm115_vm6, %v638_v35, %v2192_v15  ;;  %v652_v59 = vsel %vm115_vm6, %v2193_v1, %v638_v35  ;;  %v647_v58 = vsel %vm115_vm6, %v2190_v10, %v644_v22  ;;  %v653_v37 = vsel %vm115_vm6, %v644_v22, %v2191_v47 }
 0x29b   :  { %v660_v6 = vmul.f32 %v652_v59, %v2194_v51  ;;  %v661_v57 = vmul.f32 %v650_v61, %v2195_v25  ;;  %920 = vmatpush1.bf16.msra.mxu0 %v699_v54  ;;  %962 = vmatprep.subr.bf16.mxu1 %v702_v50  ;;  %v655_v33 = vmul.f32 %v653_v37, %v2196_v16  ;;  %v2208_v61 = vld [vmem:[#allocation26_spill] sm:$0xff]  ;;  %v2209_v59 = vld [vmem:[#allocation24_spill] sm:$0xff] }
 0x29c   :  { %963 = vmatpush1.bf16.msra.mxu1 %v701_v49  ;;  %v658_v34 = vmul.f32 %v647_v58, %v2197_v13 }
 0x29d   :  { %v665_v45 = vpack.c.bf16 %v661_v57, %v657_v30  ;;  %v646_v0 = vpop.permute.xlu0 %645  ;;  %v600_v56 = vpop.permute.xlu1 %599  ;;  %v664_v60 = vpack.c.bf16 %v660_v6, %v656_v36  ;;  %v2210_v36 = vld [vmem:[#allocation11_spill] sm:$0xff]  ;;  %v2211_v30 = vld [vmem:[#allocation12_spill] sm:$0xff] }
 0x29e   :  { %v648_v46 = vsel %vm115_vm6, %v2192_v15, %v646_v0  ;;  %v654_v41 = vsel %vm115_vm6, %v646_v0, %v2193_v1  ;;  %v613_v24 = vsel %vm62_vm7, %v600_v56, %v2198_v26  ;;  %v615_v9 = vsel %vm62_vm7, %v2199_v21, %v600_v56 }
 0x29f   :  { %v659_v38 = vmul.f32 %v654_v41, %v2196_v16  ;;  %v662_v39 = vmul.f32 %v648_v46, %v2197_v13  ;;  %921 = vmatprep.subr.bf16.mxu0 %v664_v60  ;;  %v620_v44 = vmul.f32 %v615_v9, %v2202_v42  ;;  %v621_v18 = vmul.f32 %v613_v24, %v2203_v17  ;;  %v2212_v16 = vld [vmem:[#allocation13_spill] sm:$0xff]  ;;  %v2213_v13 = vld [vmem:[#allocation14_spill] sm:$0xff] }
 0x2a1   :  { %v663_v52 = vpack.c.bf16 %v659_v38, %v655_v33  ;;  %v602_v48 = vpop.permute.xlu0 %601  ;;  %v608_v27 = vpop.permute.xlu1 %607  ;;  %v666_v23 = vpack.c.bf16 %v662_v39, %v658_v34 }
 0x2a2   :  { %v614_v4 = vsel %vm62_vm7, %v602_v48, %v2200_v20  ;;  %v616_v19 = vsel %vm62_vm7, %v2201_v62, %v602_v48  ;;  %v611_v8 = vsel %vm62_vm7, %v2198_v26, %v608_v27  ;;  %v617_v2 = vsel %vm62_vm7, %v608_v27, %v2199_v21  ;;  %v1043_v26 = vld [vmem:[%s2121_s4] ss:$8 sps:$4 sm:$0xff]  }
 0x2a3   :  { %v624_v55 = vmul.f32 %v616_v19, %v2202_v42  ;;  %v625_v53 = vmul.f32 %v614_v4, %v2203_v17  ;;  %922 = vmatpush1.bf16.msra.mxu0 %v663_v52  ;;  %964 = vmatprep.subr.bf16.mxu1 %v666_v23  ;;  %v619_v32 = vmul.f32 %v617_v2, %v2204_v7 }
 0x2a4   :  { %965 = vmatpush1.bf16.msra.mxu1 %v665_v45  ;;  %v622_v29 = vmul.f32 %v611_v8, %v2205_v31 }
 0x2a5   :  { %v629_v49 = vpack.c.bf16 %v625_v53, %v621_v18  ;;  %v610_v12 = vpop.permute.xlu0 %609  ;;  %v856_v5 = vpop.permute.xlu1 %855  ;;  %v628_v63 = vpack.c.bf16 %v624_v55, %v620_v44 }
 0x2a6   :  { %v612_v14 = vsel %vm62_vm7, %v2200_v20, %v610_v12  ;;  %v618_v28 = vsel %vm62_vm7, %v610_v12, %v2201_v62  ;;  %v869_v47 = vsel %vm437_vm8, %v856_v5, %v2206_v43  ;;  %v871_v54 = vsel %vm437_vm8, %v2207_v40, %v856_v5 }
 0x2a7   :  { %v623_v3 = vmul.f32 %v618_v28, %v2204_v7  ;;  %v626_v10 = vmul.f32 %v612_v14, %v2205_v31  ;;  %923 = vmatprep.subr.bf16.mxu0 %v628_v63  ;;  %v875_v25 = vmul.f32 %v2210_v36, %v871_v54  ;;  %v876_v6 = vmul.f32 %v2211_v30, %v869_v47 }
 0x2a9   :  { %v627_v35 = vpack.c.bf16 %v623_v3, %v619_v32  ;;  %v858_v22 = vpop.permute.xlu0 %857  ;;  %v864_v50 = vpop.permute.xlu1 %863  ;;  %v630_v15 = vpack.c.bf16 %v626_v10, %v622_v29 }
 0x2aa   :  { %v870_v1 = vsel %vm437_vm8, %v858_v22, %v2208_v61  ;;  %v872_v51 = vsel %vm437_vm8, %v2209_v59, %v858_v22  ;;  %v867_v37 = vsel %vm437_vm8, %v2206_v43, %v864_v50  ;;  %v873_v45 = vsel %vm437_vm8, %v864_v50, %v2207_v40 }
 0x2ab   :  { %v879_v57 = vmul.f32 %v2210_v36, %v872_v51  ;;  %v880_v58 = vmul.f32 %v2211_v30, %v870_v1  ;;  %924 = vmatpush1.bf16.msra.mxu0 %v627_v35  ;;  %966 = vmatprep.subr.bf16.mxu1 %v630_v15  ;;  %v877_v33 = vmul.f32 %v2212_v16, %v867_v37 }
 0x2ac   :  { %967 = vmatpush1.bf16.msra.mxu1 %v629_v49  ;;  %v878_v34 = vmul.f32 %v2213_v13, %v873_v45 }
 0x2ad   :  { %v883_v0 = vpack.c.bf16 %v879_v57, %v875_v25  ;;  %v866_v56 = vpop.permute.xlu0 %865  ;;  %v884_v60 = vpack.c.bf16 %v880_v58, %v876_v6 }
 0x2ae   :  { %v868_v46 = vsel %vm437_vm8, %v2208_v61, %v866_v56  ;;  %v874_v41 = vsel %vm437_vm8, %v866_v56, %v2209_v59 }
 0x2af   :  { %v881_v38 = vmul.f32 %v2212_v16, %v868_v46  ;;  %v882_v39 = vmul.f32 %v2213_v13, %v874_v41  ;;  %939 = vmatprep.subr.bf16.mxu0 %v884_v60 }
 0x2b0   :  { %940 = vmatpush2.bf16.msra.mxu0 %v883_v0 }
 0x2b1   :  { %v885_v24 = vpack.c.bf16 %v881_v38, %v877_v33  ;;  %v886_v21 = vpack.c.bf16 %v882_v39, %v878_v34 }
 0x2b3   :  { %942 = vmatmul.mubr.bf16.vlgmr.msra.gmra.mxu0 %v1043_v26  ;;  %982 = vmatprep.subr.bf16.mxu1 %v886_v21 }
 0x2b4   :  { %983 = vmatpush2.bf16.msra.mxu1 %v885_v24 }
 0x2b6   :  { %v890_v11 = vpop.permute.xlu1 %889 }
 0x2b7   :  { %985 = vmatmul.mubr.bf16.vlgmr.msra.gmra.mxu1 %v1043_v26 }
 0x2ba   :  { %v895_v27 = vpop.permute.xlu0 %894 }
 0x373   :  { %v943_v9 = vpop.f32.mrf.mxu0 }
 0x374   :  { %v944_v52 = vadd.f32 %v943_v9, %v890_v11 }
 0x375   :  { %v945_v48 = vpop.f32.mrf.mxu0 }
 0x376   :  { %v995_v23 = vmax.f32 %v944_v52, 0.0  ;;  %v946_v20 = vadd.f32 %v945_v48, %v890_v11 }
 0x377   :  { %v947_v4 = vpop.f32.mrf.mxu0  ;;  %v986_v62 = vpop.f32.mrf.mxu1 }
 0x378   :  { %1003 = vst [vmem:[%s2123_s6] sm:$0xff] %v995_v23  ;;  %v996_v19 = vmax.f32 %v946_v20, 0.0  ;;  %v948_v42 = vadd.f32 %v947_v4, %v895_v27  ;;  %v987_v44 = vadd.f32 %v986_v62, %v890_v11 }
 0x379   :  { %v949_v17 = vpop.f32.mrf.mxu0  ;;  %v988_v18 = vpop.f32.mrf.mxu1 }
 0x37a   :  { %1004 = vst [vmem:[%s2123_s6 + $0x8] sm:$0xff] %v996_v19  ;;  %v999_v55 = vmax.f32 %v948_v42, 0.0  ;;  %v997_v53 = vmax.f32 %v987_v44, 0.0  ;;  %v950_v8 = vadd.f32 %v949_v17, %v895_v27  ;;  %v989_v2 = vadd.f32 %v988_v18, %v890_v11 }
 0x37b   :  { %v990_v49 = vpop.f32.mrf.mxu1 }
 0x37c   :  { %1007 = vst [vmem:[%s2123_s6 + $0x20] sm:$0xff] %v999_v55  ;;  %1005 = vst [vmem:[%s2123_s6 + $0x10] sm:$0xff] %v997_v53  ;;  %v1000_v12 = vmax.f32 %v950_v8, 0.0  ;;  %v998_v5 = vmax.f32 %v989_v2, 0.0  ;;  %v991_v63 = vadd.f32 %v990_v49, %v895_v27 }
 0x37d   :  { %v992_v14 = vpop.f32.mrf.mxu1 }
 0x37e   :  { %1008 = vst [vmem:[%s2123_s6 + $0x28] sm:$0xff] %v1000_v12  ;;  %1006 = vst [vmem:[%s2123_s6 + $0x18] sm:$0xff] %v998_v5  ;;  %v1001_v28 = vmax.f32 %v991_v63, 0.0  ;;  %v993_v7 = vadd.f32 %v992_v14, %v895_v27 }
 0x380   :  { %1009 = vst [vmem:[%s2123_s6 + $0x30] sm:$0xff] %v1001_v28  ;;  %v1002_v32 = vmax.f32 %v993_v7, 0.0 }
 0x382   :  { %1010 = vst [vmem:[%s2123_s6 + $0x38] sm:$0xff] %v1002_v32 }

</bundles_post_ra>
